<compile_context>
chip_gen: v7x
topology: tpu7x:2x2x1
jax: 0.10.0
libtpu: 0.0.40
codegen_flags: <defaults>
</compile_context>

<pallas_src>
import math
import functools

import jax
import jax.numpy as jnp
from jax.experimental import pallas as pl
from jax.experimental.pallas import tpu as pltpu


def _layer_norm(x, gamma, beta, eps):
    # torch.nn.LayerNorm over the last axis (biased variance), f32 math.
    mean = jnp.mean(x, axis=-1, keepdims=True)
    var = jnp.mean((x - mean) ** 2, axis=-1, keepdims=True)
    return (x - mean) * jax.lax.rsqrt(var + eps) * gamma + beta


def bert_layer_kernel(
    x_ref, ctx_ref, mask_ref,
    wq_ref, bq_ref, wkv_ref, bkv_ref,
    wo_ref, bo_ref, g1_ref, be1_ref,
    wi_ref, bi_ref, w2_ref, b2_ref, g2_ref, be2_ref,
    out_ref,
    k_vmem, v_vmem,
    *, num_heads, head_size, eps,
):
    """One full BertLayer for a single (batch, query-tile) grid cell.

    MXU matmuls take bf16 operands and accumulate in f32; all element-wise math
    (softmax, LayerNorm, GELU, residuals) stays in f32.
    """
    f32 = jnp.float32
    bf16 = jnp.bfloat16
    H = num_heads * head_size

    # ---- K/V projection: fused (H, 2H) matmul over the full context, computed
    #      once per batch element and cached in VMEM scratch for all query tiles.
    @pl.when(pl.program_id(1) == 0)
    def _():
        ctx_bf = ctx_ref[0].astype(bf16)                     # (S_kv, H)
        kv = jnp.dot(ctx_bf, wkv_ref[...],
                     preferred_element_type=f32) + bkv_ref[0]
        k_vmem[...] = kv[:, :H].astype(bf16)
        v_vmem[...] = kv[:, H:].astype(bf16)

    x = x_ref[0].astype(f32)           # (Tq, H)    residual / LN math in f32
    x_bf = x.astype(bf16)              # bf16 MXU operand
    mask = mask_ref[0].astype(f32)     # (Tq, S_kv) additive attention mask

    # ---- BertSelfAttention Q projection for this query tile ----
    q = jnp.dot(x_bf, wq_ref[...], preferred_element_type=f32) + bq_ref[0]
    # Pre-scale q once (hoisted out of the per-head attention math).
    q = q * (1.0 / math.sqrt(head_size))

    q_bf = q.astype(bf16)
    k_bf = k_vmem[...]
    v_bf = v_vmem[...]

    # TODO(synk): heads are processed with a statically-unrolled loop; the
    # batched (num_heads, S, head_size) einsum variant requires a rank-3
    # (1,0,2) relayout whose Mosaic lowering is not guaranteed, so it is
    # deliberately left out to keep the kernel compiling cleanly.
    ctx_heads = []
    for h in range(num_heads):
        sl = slice(h * head_size, (h + 1) * head_size)
        qh, kh, vh = q_bf[:, sl], k_bf[:, sl], v_bf[:, sl]
        # scores = (q / sqrt(d)) @ k.T + mask   (bf16 in, f32 accumulate)
        scores = jax.lax.dot_general(
            qh, kh, (((1,), (1,)), ((), ())),
            preferred_element_type=f32) + mask
        # numerically stable softmax along keys (f32)
        scores = scores - jnp.max(scores, axis=-1, keepdims=True)
        p = jnp.exp(scores)
        # attention-probs dropout is identity in eval mode
        p = p * pl.reciprocal(jnp.sum(p, axis=-1, keepdims=True), approx=True)
        ctx_heads.append(jnp.dot(p.astype(bf16), vh,
                                 preferred_element_type=f32))
    attn = jnp.concatenate(ctx_heads, axis=-1)  # (Tq, H), heads re-merged

    # ---- BertSelfOutput: dense + (dropout=id) + residual + LayerNorm ----
    attn_out = jnp.dot(attn.astype(bf16), wo_ref[...],
                       preferred_element_type=f32) + bo_ref[0]
    attn_out = _layer_norm(x + attn_out, g1_ref[0], be1_ref[0], eps)

    # ---- BertIntermediate: dense + gelu ----
    inter = jnp.dot(attn_out.astype(bf16), wi_ref[...],
                    preferred_element_type=f32) + bi_ref[0]
    # TODO(synk): torch F.gelu defaults to exact erf; using tanh-approx gelu
    # (safe EUP tanh lowering), max abs deviation ~1e-3.
    inter = jax.nn.gelu(inter, approximate=True)

    # ---- BertOutput: dense + (dropout=id) + residual + LayerNorm ----
    # GELU output cast to bf16 (largest activation) before the w2 matmul.
    out = jnp.dot(inter.astype(bf16), w2_ref[...],
                  preferred_element_type=f32) + b2_ref[0]
    out = _layer_norm(attn_out + out, g2_ref[0], be2_ref[0], eps)

    out_ref[0] = out.astype(out_ref.dtype)


def bert_layer(x, ctx, mask, params, *, num_heads, eps, q_tile=256):
    """Run one BertLayer with a Pallas kernel over a (batch, query-tile) grid."""
    B, S, H = x.shape
    S_kv = ctx.shape[1]
    head_size = H // num_heads

    (wq, bq, wk, bk, wv, bv, wo, bo, g1, be1,
     wi, bi, w2, b2, g2, be2) = params
    # Fuse the K and V projection weights/biases into one (H, 2H) matmul.
    wkv = jnp.concatenate([wk, wv], axis=1)
    bkv = jnp.concatenate([bk, bv], axis=1)
    fused = (wq, bq, wkv, bkv, wo, bo, g1, be1, wi, bi, w2, b2, g2, be2)

    # Query-axis tile: largest divisor of S not exceeding q_tile.
    tq = min(q_tile, S)
    while S % tq != 0:
        tq -= 1
    n_q = S // tq

    kernel = functools.partial(
        bert_layer_kernel, num_heads=num_heads, head_size=head_size, eps=eps)

    in_specs = [
        pl.BlockSpec((1, tq, H), lambda b, i: (b, i, 0)),     # query tile
        pl.BlockSpec((1, S_kv, H), lambda b, i: (b, 0, 0)),   # full context
        pl.BlockSpec((1, tq, S_kv), lambda b, i: (b, i, 0)),  # mask tile
    ]
    # Weights / biases / LN params: full-array blocks with constant index_maps,
    # so they stay resident in VMEM across the entire grid.
    # TODO(synk): pl.Buffered(1) on these specs would halve resident weight
    # VMEM (most relevant on v7x); omitted to keep the lowering conservative.
    for p in fused:
        in_specs.append(pl.BlockSpec(p.shape, lambda b, i: (0, 0)))

    # Explicit VMEM budget: bf16 weights (double-buffered) + f32 activation
    # working set for one grid step + bf16 K/V scratch, plus headroom; clamped.
    inter_dim = wi.shape[1]
    w_bytes = sum(int(p.size) * p.dtype.itemsize for p in fused)
    act_bytes = 4 * (8 * tq * H + 4 * S_kv * H + 3 * tq * S_kv + 2 * tq * inter_dim)
    kv_scratch_bytes = 4 * S_kv * H  # two bf16 (S_kv, H) buffers
    vmem_limit = int(2 * w_bytes + 2 * act_bytes + kv_scratch_bytes) + (8 << 20)
    vmem_limit = max(16 << 20, min(vmem_limit, 96 << 20))

    return pl.pallas_call(
        kernel,
        out_shape=jax.ShapeDtypeStruct((B, S, H), x.dtype),
        grid=(B, n_q),
        in_specs=in_specs,
        out_specs=pl.BlockSpec((1, tq, H), lambda b, i: (b, i, 0)),
        scratch_shapes=[
            pltpu.VMEM((S_kv, H), jnp.bfloat16),  # cached K (bf16, per batch elem)
            pltpu.VMEM((S_kv, H), jnp.bfloat16),  # cached V
        ],
        compiler_params=pltpu.CompilerParams(
            # Query-tile axis is "arbitrary" so the pl.when(i==0) K/V projection
            # is guaranteed to run before the tiles that consume the scratch.
            dimension_semantics=("parallel", "arbitrary"),
            vmem_limit_bytes=vmem_limit),
    )(x, ctx, mask, *fused)


def bert_encoder(query_hidden_states, layer_params, *, context_hidden_states=None,
                 attention_mask=None, num_heads, eps):
    """Mirrors stacking of BertLayer.forward: sequentially applies each layer."""
    x = query_hidden_states
    B, S, _ = x.shape
    if attention_mask is None:
        S_kv = S if context_hidden_states is None else context_hidden_states.shape[1]
        attention_mask = jnp.zeros((B, S, S_kv), x.dtype)  # additive zeros == no mask
    for params in layer_params:
        ctx = x if context_hidden_states is None else context_hidden_states
        x = bert_layer(x, ctx, attention_mask, params, num_heads=num_heads, eps=eps)
    return x


def init_layer_params(key, hidden, intermediate):
    """Deterministic synthetic parameters for one BertLayer.

    Matmul weights are stored in bf16 (MXU-native operands); biases and
    LayerNorm parameters stay in f32.
    """
    ks = jax.random.split(key, 12)
    w = lambda k, shape: (0.02 * jax.random.normal(k, shape)).astype(jnp.bfloat16)
    row = lambda k, d: (0.02 * jax.random.normal(k, (1, d))).astype(jnp.float32)
    wq, wk, wv, wo = (w(ks[i], (hidden, hidden)) for i in range(4))
    bq, bk, bv, bo = (row(ks[4 + i], hidden) for i in range(4))
    g1, be1 = jnp.ones((1, hidden), jnp.float32), jnp.zeros((1, hidden), jnp.float32)
    wi, bi = w(ks[8], (hidden, intermediate)), row(ks[9], intermediate)
    w2, b2 = w(ks[10], (intermediate, hidden)), row(ks[11], hidden)
    g2, be2 = jnp.ones((1, hidden), jnp.float32), jnp.zeros((1, hidden), jnp.float32)
    return (wq, bq, wk, bk, wv, bv, wo, bo, g1, be1, wi, bi, w2, b2, g2, be2)


if __name__ == "__main__":
    # config: hidden_size=32, num_attention_heads=4, intermediate_size=64,
    #         num_hidden_layers=2, layer_norm_eps=1e-12; batch=2, seq=8.
    B, S, H, NH, I, L = 2, 8, 32, 4, 64, 2
    EPS = 1e-12

    root = jax.random.PRNGKey(0)
    keys = jax.random.split(root, 1 + L)
    x = jax.random.normal(keys[0], (B, S, H), jnp.float32)
    layer_params = [init_layer_params(keys[1 + l], H, I) for l in range(L)]

    out = bert_encoder(x, layer_params, context_hidden_states=None,
                       attention_mask=None, num_heads=NH, eps=EPS)
    jax.block_until_ready(out)
    assert out.shape == (B, S, H) and out.dtype == jnp.float32
    print("KERNEL_OK")
</pallas_src>

<mosaic_0001>
module attributes {stable_mosaic.version = 11 : i64} {
  func.func @bert_layer_kernel(%arg0: i32, %arg1: i32, %arg2: memref<1x8x32xf32, #tpu.memory_space<vmem>>, %arg3: memref<1x8x32xf32, #tpu.memory_space<vmem>>, %arg4: memref<1x8x8xf32, #tpu.memory_space<vmem>>, %arg5: memref<32x32xbf16, #tpu.memory_space<vmem>>, %arg6: memref<1x32xf32, #tpu.memory_space<vmem>>, %arg7: memref<32x64xbf16, #tpu.memory_space<vmem>>, %arg8: memref<1x64xf32, #tpu.memory_space<vmem>>, %arg9: memref<32x32xbf16, #tpu.memory_space<vmem>>, %arg10: memref<1x32xf32, #tpu.memory_space<vmem>>, %arg11: memref<1x32xf32, #tpu.memory_space<vmem>>, %arg12: memref<1x32xf32, #tpu.memory_space<vmem>>, %arg13: memref<32x64xbf16, #tpu.memory_space<vmem>>, %arg14: memref<1x64xf32, #tpu.memory_space<vmem>>, %arg15: memref<64x32xbf16, #tpu.memory_space<vmem>>, %arg16: memref<1x32xf32, #tpu.memory_space<vmem>>, %arg17: memref<1x32xf32, #tpu.memory_space<vmem>>, %arg18: memref<1x32xf32, #tpu.memory_space<vmem>>, %arg19: memref<1x8x32xf32, #tpu.memory_space<vmem>>, %arg20: memref<8x32xbf16, #tpu.memory_space<vmem>>, %arg21: memref<8x32xbf16, #tpu.memory_space<vmem>>) attributes {dimension_semantics = [#tpu.dimension_semantics<parallel>, #tpu.dimension_semantics<arbitrary>], iteration_bounds = array<i64: 2, 1>, scalar_prefetch = 0 : i64, scratch_operands = 2 : i64, tpu.core_type = #tpu.core_type<tc>, window_params = [{transform_indices = @transform_0, window_bounds = array<i64: 1, 8, 32>}, {transform_indices = @transform_1, window_bounds = array<i64: 1, 8, 32>}, {transform_indices = @transform_2, window_bounds = array<i64: 1, 8, 8>}, {pipeline_mode = #tpu.pipeline_mode<synchronous>, transform_indices = @transform_3, window_bounds = array<i64: 32, 32>}, {pipeline_mode = #tpu.pipeline_mode<synchronous>, transform_indices = @transform_4, window_bounds = array<i64: 1, 32>}, {pipeline_mode = #tpu.pipeline_mode<synchronous>, transform_indices = @transform_5, window_bounds = array<i64: 32, 64>}, {pipeline_mode = #tpu.pipeline_mode<synchronous>, transform_indices = @transform_6, window_bounds = array<i64: 1, 64>}, {pipeline_mode = #tpu.pipeline_mode<synchronous>, transform_indices = @transform_7, window_bounds = array<i64: 32, 32>}, {pipeline_mode = #tpu.pipeline_mode<synchronous>, transform_indices = @transform_8, window_bounds = array<i64: 1, 32>}, {pipeline_mode = #tpu.pipeline_mode<synchronous>, transform_indices = @transform_9, window_bounds = array<i64: 1, 32>}, {pipeline_mode = #tpu.pipeline_mode<synchronous>, transform_indices = @transform_10, window_bounds = array<i64: 1, 32>}, {pipeline_mode = #tpu.pipeline_mode<synchronous>, transform_indices = @transform_11, window_bounds = array<i64: 32, 64>}, {pipeline_mode = #tpu.pipeline_mode<synchronous>, transform_indices = @transform_12, window_bounds = array<i64: 1, 64>}, {pipeline_mode = #tpu.pipeline_mode<synchronous>, transform_indices = @transform_13, window_bounds = array<i64: 64, 32>}, {pipeline_mode = #tpu.pipeline_mode<synchronous>, transform_indices = @transform_14, window_bounds = array<i64: 1, 32>}, {pipeline_mode = #tpu.pipeline_mode<synchronous>, transform_indices = @transform_15, window_bounds = array<i64: 1, 32>}, {pipeline_mode = #tpu.pipeline_mode<synchronous>, transform_indices = @transform_16, window_bounds = array<i64: 1, 32>}, {transform_indices = @transform_17, window_bounds = array<i64: 1, 8, 32>}]} {
    %c0_i32 = arith.constant 0 : i32
    %0 = arith.cmpi eq, %arg1, %c0_i32 : i32
    %1 = arith.extui %0 : i1 to i32
    %c0_i32_0 = arith.constant 0 : i32
    %2 = arith.cmpi ne, %1, %c0_i32_0 : i32
    scf.if %2 {
      %c0_71 = arith.constant 0 : index
      %c0_72 = arith.constant 0 : index
      %c0_73 = arith.constant 0 : index
      %187 = vector.load %arg3[%c0_71, %c0_72, %c0_73] : memref<1x8x32xf32, #tpu.memory_space<vmem>>, vector<1x8x32xf32>
      %188 = vector.shape_cast %187 : vector<1x8x32xf32> to vector<8x32xf32>
      %189 = arith.truncf %188 : vector<8x32xf32> to vector<8x32xbf16>
      %c0_74 = arith.constant 0 : index
      %c0_75 = arith.constant 0 : index
      %190 = vector.load %arg7[%c0_74, %c0_75] : memref<32x64xbf16, #tpu.memory_space<vmem>>, vector<32x64xbf16>
      %cst_76 = arith.constant dense<0.000000e+00> : vector<8x64xf32>
      %191 = tpu.matmul %189, %190, %cst_76 {dimension_numbers = #tpu.dot_dimension_numbers<[1], [0], [0], [1], [0, 0, 1, 1], [], []>} : vector<8x32xbf16>, vector<32x64xbf16>, vector<8x64xf32> -> vector<8x64xf32>
      %c0_77 = arith.constant 0 : index
      %c0_78 = arith.constant 0 : index
      %192 = vector.load %arg8[%c0_77, %c0_78] : memref<1x64xf32, #tpu.memory_space<vmem>>, vector<1x64xf32>
      %193 = vector.shape_cast %192 : vector<1x64xf32> to vector<64xf32>
      %194 = vector.shape_cast %193 : vector<64xf32> to vector<1x64xf32>
      %195 = vector.broadcast %194 : vector<1x64xf32> to vector<8x64xf32>
      %196 = arith.addf %191, %195 : vector<8x64xf32>
      %197 = vector.extract_strided_slice %196 {offsets = [0, 0], sizes = [8, 32], strides = [1, 1]} : vector<8x64xf32> to vector<8x32xf32>
      %198 = arith.truncf %197 : vector<8x32xf32> to vector<8x32xbf16>
      %c0_79 = arith.constant 0 : index
      %c0_80 = arith.constant 0 : index
      %199 = vector.load %arg20[%c0_79, %c0_80] : memref<8x32xbf16, #tpu.memory_space<vmem>>, vector<8x32xbf16>
      tpu.vector_store %arg20[%c0_79, %c0_80], %198 {strides = array<i32>} : memref<8x32xbf16, #tpu.memory_space<vmem>>, vector<8x32xbf16>,
      %200 = vector.extract_strided_slice %196 {offsets = [0, 32], sizes = [8, 32], strides = [1, 1]} : vector<8x64xf32> to vector<8x32xf32>
      %201 = arith.truncf %200 : vector<8x32xf32> to vector<8x32xbf16>
      %c0_81 = arith.constant 0 : index
      %c0_82 = arith.constant 0 : index
      %202 = vector.load %arg21[%c0_81, %c0_82] : memref<8x32xbf16, #tpu.memory_space<vmem>>, vector<8x32xbf16>
      tpu.vector_store %arg21[%c0_81, %c0_82], %201 {strides = array<i32>} : memref<8x32xbf16, #tpu.memory_space<vmem>>, vector<8x32xbf16>,
    } else {
    }
    %c0 = arith.constant 0 : index
    %c0_1 = arith.constant 0 : index
    %c0_2 = arith.constant 0 : index
    %3 = vector.load %arg2[%c0, %c0_1, %c0_2] : memref<1x8x32xf32, #tpu.memory_space<vmem>>, vector<1x8x32xf32>
    %4 = vector.shape_cast %3 : vector<1x8x32xf32> to vector<8x32xf32>
    %5 = arith.truncf %4 : vector<8x32xf32> to vector<8x32xbf16>
    %c0_3 = arith.constant 0 : index
    %c0_4 = arith.constant 0 : index
    %c0_5 = arith.constant 0 : index
    %6 = vector.load %arg4[%c0_3, %c0_4, %c0_5] : memref<1x8x8xf32, #tpu.memory_space<vmem>>, vector<1x8x8xf32>
    %7 = vector.shape_cast %6 : vector<1x8x8xf32> to vector<8x8xf32>
    %c0_6 = arith.constant 0 : index
    %c0_7 = arith.constant 0 : index
    %8 = vector.load %arg5[%c0_6, %c0_7] : memref<32x32xbf16, #tpu.memory_space<vmem>>, vector<32x32xbf16>
    %cst = arith.constant dense<0.000000e+00> : vector<8x32xf32>
    %9 = tpu.matmul %5, %8, %cst {dimension_numbers = #tpu.dot_dimension_numbers<[1], [0], [0], [1], [0, 0, 1, 1], [], []>} : vector<8x32xbf16>, vector<32x32xbf16>, vector<8x32xf32> -> vector<8x32xf32>
    %c0_8 = arith.constant 0 : index
    %c0_9 = arith.constant 0 : index
    %10 = vector.load %arg6[%c0_8, %c0_9] : memref<1x32xf32, #tpu.memory_space<vmem>>, vector<1x32xf32>
    %11 = vector.shape_cast %10 : vector<1x32xf32> to vector<32xf32>
    %12 = vector.shape_cast %11 : vector<32xf32> to vector<1x32xf32>
    %13 = vector.broadcast %12 : vector<1x32xf32> to vector<8x32xf32>
    %14 = arith.addf %9, %13 : vector<8x32xf32>
    %cst_10 = arith.constant 0.353553385 : f32
    %15 = vector.broadcast %cst_10 : f32 to vector<8x32xf32>
    %16 = arith.mulf %14, %15 : vector<8x32xf32>
    %17 = arith.truncf %16 : vector<8x32xf32> to vector<8x32xbf16>
    %c0_11 = arith.constant 0 : index
    %c0_12 = arith.constant 0 : index
    %18 = vector.load %arg20[%c0_11, %c0_12] : memref<8x32xbf16, #tpu.memory_space<vmem>>, vector<8x32xbf16>
    %c0_13 = arith.constant 0 : index
    %c0_14 = arith.constant 0 : index
    %19 = vector.load %arg21[%c0_13, %c0_14] : memref<8x32xbf16, #tpu.memory_space<vmem>>, vector<8x32xbf16>
    %20 = vector.extract_strided_slice %17 {offsets = [0, 0], sizes = [8, 8], strides = [1, 1]} : vector<8x32xbf16> to vector<8x8xbf16>
    %21 = vector.extract_strided_slice %18 {offsets = [0, 0], sizes = [8, 8], strides = [1, 1]} : vector<8x32xbf16> to vector<8x8xbf16>
    %22 = vector.extract_strided_slice %19 {offsets = [0, 0], sizes = [8, 8], strides = [1, 1]} : vector<8x32xbf16> to vector<8x8xbf16>
    %cst_15 = arith.constant dense<0.000000e+00> : vector<8x8xf32>
    %23 = tpu.matmul %20, %21, %cst_15 {dimension_numbers = #tpu.dot_dimension_numbers<[1], [1], [0], [0], [0, 0, 1, 0], [], []>} : vector<8x8xbf16>, vector<8x8xbf16>, vector<8x8xf32> -> vector<8x8xf32>
    %24 = arith.addf %23, %7 : vector<8x8xf32>
    %cst_16 = arith.constant dense<0xFF800000> : vector<8xf32>
    %25 = vector.multi_reduction <maximumf>, %24, %cst_16 [1] : vector<8x8xf32> to vector<8xf32>
    %26 = vector.shape_cast %25 : vector<8xf32> to vector<8x1xf32>
    %27 = vector.broadcast %26 : vector<8x1xf32> to vector<8x8xf32>
    %28 = arith.subf %24, %27 : vector<8x8xf32>
    %29 = math.exp %28 : vector<8x8xf32>
    %cst_17 = arith.constant dense<0.000000e+00> : vector<8xf32>
    %30 = vector.multi_reduction <add>, %29, %cst_17 [1] : vector<8x8xf32> to vector<8xf32>
    %31 = vector.shape_cast %30 : vector<8xf32> to vector<8x1xf32>
    %32 = tpu.reciprocal %31 {approx = true} : vector<8x1xf32> -> vector<8x1xf32>
    %33 = vector.broadcast %32 : vector<8x1xf32> to vector<8x8xf32>
    %34 = arith.mulf %29, %33 : vector<8x8xf32>
    %35 = arith.truncf %34 : vector<8x8xf32> to vector<8x8xbf16>
    %cst_18 = arith.constant dense<0.000000e+00> : vector<8x8xf32>
    %36 = tpu.matmul %35, %22, %cst_18 {dimension_numbers = #tpu.dot_dimension_numbers<[1], [0], [0], [1], [0, 0, 1, 1], [], []>} : vector<8x8xbf16>, vector<8x8xbf16>, vector<8x8xf32> -> vector<8x8xf32>
    %37 = vector.extract_strided_slice %17 {offsets = [0, 8], sizes = [8, 8], strides = [1, 1]} : vector<8x32xbf16> to vector<8x8xbf16>
    %38 = vector.extract_strided_slice %18 {offsets = [0, 8], sizes = [8, 8], strides = [1, 1]} : vector<8x32xbf16> to vector<8x8xbf16>
    %39 = vector.extract_strided_slice %19 {offsets = [0, 8], sizes = [8, 8], strides = [1, 1]} : vector<8x32xbf16> to vector<8x8xbf16>
    %cst_19 = arith.constant dense<0.000000e+00> : vector<8x8xf32>
    %40 = tpu.matmul %37, %38, %cst_19 {dimension_numbers = #tpu.dot_dimension_numbers<[1], [1], [0], [0], [0, 0, 1, 0], [], []>} : vector<8x8xbf16>, vector<8x8xbf16>, vector<8x8xf32> -> vector<8x8xf32>
    %41 = arith.addf %40, %7 : vector<8x8xf32>
    %cst_20 = arith.constant dense<0xFF800000> : vector<8xf32>
    %42 = vector.multi_reduction <maximumf>, %41, %cst_20 [1] : vector<8x8xf32> to vector<8xf32>
    %43 = vector.shape_cast %42 : vector<8xf32> to vector<8x1xf32>
    %44 = vector.broadcast %43 : vector<8x1xf32> to vector<8x8xf32>
    %45 = arith.subf %41, %44 : vector<8x8xf32>
    %46 = math.exp %45 : vector<8x8xf32>
    %cst_21 = arith.constant dense<0.000000e+00> : vector<8xf32>
    %47 = vector.multi_reduction <add>, %46, %cst_21 [1] : vector<8x8xf32> to vector<8xf32>
    %48 = vector.shape_cast %47 : vector<8xf32> to vector<8x1xf32>
    %49 = tpu.reciprocal %48 {approx = true} : vector<8x1xf32> -> vector<8x1xf32>
    %50 = vector.broadcast %49 : vector<8x1xf32> to vector<8x8xf32>
    %51 = arith.mulf %46, %50 : vector<8x8xf32>
    %52 = arith.truncf %51 : vector<8x8xf32> to vector<8x8xbf16>
    %cst_22 = arith.constant dense<0.000000e+00> : vector<8x8xf32>
    %53 = tpu.matmul %52, %39, %cst_22 {dimension_numbers = #tpu.dot_dimension_numbers<[1], [0], [0], [1], [0, 0, 1, 1], [], []>} : vector<8x8xbf16>, vector<8x8xbf16>, vector<8x8xf32> -> vector<8x8xf32>
    %54 = vector.extract_strided_slice %17 {offsets = [0, 16], sizes = [8, 8], strides = [1, 1]} : vector<8x32xbf16> to vector<8x8xbf16>
    %55 = vector.extract_strided_slice %18 {offsets = [0, 16], sizes = [8, 8], strides = [1, 1]} : vector<8x32xbf16> to vector<8x8xbf16>
    %56 = vector.extract_strided_slice %19 {offsets = [0, 16], sizes = [8, 8], strides = [1, 1]} : vector<8x32xbf16> to vector<8x8xbf16>
    %cst_23 = arith.constant dense<0.000000e+00> : vector<8x8xf32>
    %57 = tpu.matmul %54, %55, %cst_23 {dimension_numbers = #tpu.dot_dimension_numbers<[1], [1], [0], [0], [0, 0, 1, 0], [], []>} : vector<8x8xbf16>, vector<8x8xbf16>, vector<8x8xf32> -> vector<8x8xf32>
    %58 = arith.addf %57, %7 : vector<8x8xf32>
    %cst_24 = arith.constant dense<0xFF800000> : vector<8xf32>
    %59 = vector.multi_reduction <maximumf>, %58, %cst_24 [1] : vector<8x8xf32> to vector<8xf32>
    %60 = vector.shape_cast %59 : vector<8xf32> to vector<8x1xf32>
    %61 = vector.broadcast %60 : vector<8x1xf32> to vector<8x8xf32>
    %62 = arith.subf %58, %61 : vector<8x8xf32>
    %63 = math.exp %62 : vector<8x8xf32>
    %cst_25 = arith.constant dense<0.000000e+00> : vector<8xf32>
    %64 = vector.multi_reduction <add>, %63, %cst_25 [1] : vector<8x8xf32> to vector<8xf32>
    %65 = vector.shape_cast %64 : vector<8xf32> to vector<8x1xf32>
    %66 = tpu.reciprocal %65 {approx = true} : vector<8x1xf32> -> vector<8x1xf32>
    %67 = vector.broadcast %66 : vector<8x1xf32> to vector<8x8xf32>
    %68 = arith.mulf %63, %67 : vector<8x8xf32>
    %69 = arith.truncf %68 : vector<8x8xf32> to vector<8x8xbf16>
    %cst_26 = arith.constant dense<0.000000e+00> : vector<8x8xf32>
    %70 = tpu.matmul %69, %56, %cst_26 {dimension_numbers = #tpu.dot_dimension_numbers<[1], [0], [0], [1], [0, 0, 1, 1], [], []>} : vector<8x8xbf16>, vector<8x8xbf16>, vector<8x8xf32> -> vector<8x8xf32>
    %71 = vector.extract_strided_slice %17 {offsets = [0, 24], sizes = [8, 8], strides = [1, 1]} : vector<8x32xbf16> to vector<8x8xbf16>
    %72 = vector.extract_strided_slice %18 {offsets = [0, 24], sizes = [8, 8], strides = [1, 1]} : vector<8x32xbf16> to vector<8x8xbf16>
    %73 = vector.extract_strided_slice %19 {offsets = [0, 24], sizes = [8, 8], strides = [1, 1]} : vector<8x32xbf16> to vector<8x8xbf16>
    %cst_27 = arith.constant dense<0.000000e+00> : vector<8x8xf32>
    %74 = tpu.matmul %71, %72, %cst_27 {dimension_numbers = #tpu.dot_dimension_numbers<[1], [1], [0], [0], [0, 0, 1, 0], [], []>} : vector<8x8xbf16>, vector<8x8xbf16>, vector<8x8xf32> -> vector<8x8xf32>
    %75 = arith.addf %74, %7 : vector<8x8xf32>
    %cst_28 = arith.constant dense<0xFF800000> : vector<8xf32>
    %76 = vector.multi_reduction <maximumf>, %75, %cst_28 [1] : vector<8x8xf32> to vector<8xf32>
    %77 = vector.shape_cast %76 : vector<8xf32> to vector<8x1xf32>
    %78 = vector.broadcast %77 : vector<8x1xf32> to vector<8x8xf32>
    %79 = arith.subf %75, %78 : vector<8x8xf32>
    %80 = math.exp %79 : vector<8x8xf32>
    %cst_29 = arith.constant dense<0.000000e+00> : vector<8xf32>
    %81 = vector.multi_reduction <add>, %80, %cst_29 [1] : vector<8x8xf32> to vector<8xf32>
    %82 = vector.shape_cast %81 : vector<8xf32> to vector<8x1xf32>
    %83 = tpu.reciprocal %82 {approx = true} : vector<8x1xf32> -> vector<8x1xf32>
    %84 = vector.broadcast %83 : vector<8x1xf32> to vector<8x8xf32>
    %85 = arith.mulf %80, %84 : vector<8x8xf32>
    %86 = arith.truncf %85 : vector<8x8xf32> to vector<8x8xbf16>
    %cst_30 = arith.constant dense<0.000000e+00> : vector<8x8xf32>
    %87 = tpu.matmul %86, %73, %cst_30 {dimension_numbers = #tpu.dot_dimension_numbers<[1], [0], [0], [1], [0, 0, 1, 1], [], []>} : vector<8x8xbf16>, vector<8x8xbf16>, vector<8x8xf32> -> vector<8x8xf32>
    %88 = tpu.concatenate %36, %53, %70, %87 in 1 : vector<8x8xf32>, vector<8x8xf32>, vector<8x8xf32>, vector<8x8xf32> -> vector<8x32xf32>
    %89 = arith.truncf %88 : vector<8x32xf32> to vector<8x32xbf16>
    %c0_31 = arith.constant 0 : index
    %c0_32 = arith.constant 0 : index
    %90 = vector.load %arg9[%c0_31, %c0_32] : memref<32x32xbf16, #tpu.memory_space<vmem>>, vector<32x32xbf16>
    %cst_33 = arith.constant dense<0.000000e+00> : vector<8x32xf32>
    %91 = tpu.matmul %89, %90, %cst_33 {dimension_numbers = #tpu.dot_dimension_numbers<[1], [0], [0], [1], [0, 0, 1, 1], [], []>} : vector<8x32xbf16>, vector<32x32xbf16>, vector<8x32xf32> -> vector<8x32xf32>
    %c0_34 = arith.constant 0 : index
    %c0_35 = arith.constant 0 : index
    %92 = vector.load %arg10[%c0_34, %c0_35] : memref<1x32xf32, #tpu.memory_space<vmem>>, vector<1x32xf32>
    %93 = vector.shape_cast %92 : vector<1x32xf32> to vector<32xf32>
    %94 = vector.shape_cast %93 : vector<32xf32> to vector<1x32xf32>
    %95 = vector.broadcast %94 : vector<1x32xf32> to vector<8x32xf32>
    %96 = arith.addf %91, %95 : vector<8x32xf32>
    %97 = arith.addf %4, %96 : vector<8x32xf32>
    %c0_36 = arith.constant 0 : index
    %c0_37 = arith.constant 0 : index
    %98 = vector.load %arg11[%c0_36, %c0_37] : memref<1x32xf32, #tpu.memory_space<vmem>>, vector<1x32xf32>
    %99 = vector.shape_cast %98 : vector<1x32xf32> to vector<32xf32>
    %c0_38 = arith.constant 0 : index
    %c0_39 = arith.constant 0 : index
    %100 = vector.load %arg12[%c0_38, %c0_39] : memref<1x32xf32, #tpu.memory_space<vmem>>, vector<1x32xf32>
    %101 = vector.shape_cast %100 : vector<1x32xf32> to vector<32xf32>
    %cst_40 = arith.constant dense<0.000000e+00> : vector<8xf32>
    %102 = vector.multi_reduction <add>, %97, %cst_40 [1] : vector<8x32xf32> to vector<8xf32>
    %103 = vector.shape_cast %102 : vector<8xf32> to vector<8x1xf32>
    %cst_41 = arith.constant 3.200000e+01 : f32
    %104 = vector.broadcast %cst_41 : f32 to vector<8x1xf32>
    %105 = arith.divf %103, %104 : vector<8x1xf32>
    %106 = vector.broadcast %105 : vector<8x1xf32> to vector<8x32xf32>
    %107 = arith.subf %97, %106 : vector<8x32xf32>
    %108 = arith.mulf %107, %107 : vector<8x32xf32>
    %cst_42 = arith.constant dense<0.000000e+00> : vector<8xf32>
    %109 = vector.multi_reduction <add>, %108, %cst_42 [1] : vector<8x32xf32> to vector<8xf32>
    %110 = vector.shape_cast %109 : vector<8xf32> to vector<8x1xf32>
    %cst_43 = arith.constant 3.200000e+01 : f32
    %111 = vector.broadcast %cst_43 : f32 to vector<8x1xf32>
    %112 = arith.divf %110, %111 : vector<8x1xf32>
    %113 = vector.broadcast %105 : vector<8x1xf32> to vector<8x32xf32>
    %114 = arith.subf %97, %113 : vector<8x32xf32>
    %cst_44 = arith.constant 9.99999996E-13 : f32
    %115 = vector.broadcast %cst_44 : f32 to vector<8x1xf32>
    %116 = arith.addf %112, %115 : vector<8x1xf32>
    %117 = math.rsqrt %116 : vector<8x1xf32>
    %118 = vector.broadcast %117 : vector<8x1xf32> to vector<8x32xf32>
    %119 = arith.mulf %114, %118 : vector<8x32xf32>
    %120 = vector.shape_cast %99 : vector<32xf32> to vector<1x32xf32>
    %121 = vector.broadcast %120 : vector<1x32xf32> to vector<8x32xf32>
    %122 = arith.mulf %119, %121 : vector<8x32xf32>
    %123 = vector.shape_cast %101 : vector<32xf32> to vector<1x32xf32>
    %124 = vector.broadcast %123 : vector<1x32xf32> to vector<8x32xf32>
    %125 = arith.addf %122, %124 : vector<8x32xf32>
    %126 = arith.truncf %125 : vector<8x32xf32> to vector<8x32xbf16>
    %c0_45 = arith.constant 0 : index
    %c0_46 = arith.constant 0 : index
    %127 = vector.load %arg13[%c0_45, %c0_46] : memref<32x64xbf16, #tpu.memory_space<vmem>>, vector<32x64xbf16>
    %cst_47 = arith.constant dense<0.000000e+00> : vector<8x64xf32>
    %128 = tpu.matmul %126, %127, %cst_47 {dimension_numbers = #tpu.dot_dimension_numbers<[1], [0], [0], [1], [0, 0, 1, 1], [], []>} : vector<8x32xbf16>, vector<32x64xbf16>, vector<8x64xf32> -> vector<8x64xf32>
    %c0_48 = arith.constant 0 : index
    %c0_49 = arith.constant 0 : index
    %129 = vector.load %arg14[%c0_48, %c0_49] : memref<1x64xf32, #tpu.memory_space<vmem>>, vector<1x64xf32>
    %130 = vector.shape_cast %129 : vector<1x64xf32> to vector<64xf32>
    %131 = vector.shape_cast %130 : vector<64xf32> to vector<1x64xf32>
    %132 = vector.broadcast %131 : vector<1x64xf32> to vector<8x64xf32>
    %133 = arith.addf %128, %132 : vector<8x64xf32>
    %134 = arith.mulf %133, %133 : vector<8x64xf32>
    %135 = arith.mulf %133, %134 : vector<8x64xf32>
    %cst_50 = arith.constant 4.471500e-02 : f32
    %136 = vector.broadcast %cst_50 : f32 to vector<8x64xf32>
    %137 = arith.mulf %136, %135 : vector<8x64xf32>
    %138 = arith.addf %133, %137 : vector<8x64xf32>
    %cst_51 = arith.constant 0.797884583 : f32
    %139 = vector.broadcast %cst_51 : f32 to vector<8x64xf32>
    %140 = arith.mulf %139, %138 : vector<8x64xf32>
    %141 = math.tanh %140 : vector<8x64xf32>
    %cst_52 = arith.constant 1.000000e+00 : f32
    %142 = vector.broadcast %cst_52 : f32 to vector<8x64xf32>
    %143 = arith.addf %142, %141 : vector<8x64xf32>
    %cst_53 = arith.constant 5.000000e-01 : f32
    %144 = vector.broadcast %cst_53 : f32 to vector<8x64xf32>
    %145 = arith.mulf %144, %143 : vector<8x64xf32>
    %146 = arith.mulf %133, %145 : vector<8x64xf32>
    %147 = arith.truncf %146 : vector<8x64xf32> to vector<8x64xbf16>
    %c0_54 = arith.constant 0 : index
    %c0_55 = arith.constant 0 : index
    %148 = vector.load %arg15[%c0_54, %c0_55] : memref<64x32xbf16, #tpu.memory_space<vmem>>, vector<64x32xbf16>
    %cst_56 = arith.constant dense<0.000000e+00> : vector<8x32xf32>
    %149 = tpu.matmul %147, %148, %cst_56 {dimension_numbers = #tpu.dot_dimension_numbers<[1], [0], [0], [1], [0, 0, 1, 1], [], []>} : vector<8x64xbf16>, vector<64x32xbf16>, vector<8x32xf32> -> vector<8x32xf32>
    %c0_57 = arith.constant 0 : index
    %c0_58 = arith.constant 0 : index
    %150 = vector.load %arg16[%c0_57, %c0_58] : memref<1x32xf32, #tpu.memory_space<vmem>>, vector<1x32xf32>
    %151 = vector.shape_cast %150 : vector<1x32xf32> to vector<32xf32>
    %152 = vector.shape_cast %151 : vector<32xf32> to vector<1x32xf32>
    %153 = vector.broadcast %152 : vector<1x32xf32> to vector<8x32xf32>
    %154 = arith.addf %149, %153 : vector<8x32xf32>
    %155 = arith.addf %125, %154 : vector<8x32xf32>
    %c0_59 = arith.constant 0 : index
    %c0_60 = arith.constant 0 : index
    %156 = vector.load %arg17[%c0_59, %c0_60] : memref<1x32xf32, #tpu.memory_space<vmem>>, vector<1x32xf32>
    %157 = vector.shape_cast %156 : vector<1x32xf32> to vector<32xf32>
    %c0_61 = arith.constant 0 : index
    %c0_62 = arith.constant 0 : index
    %158 = vector.load %arg18[%c0_61, %c0_62] : memref<1x32xf32, #tpu.memory_space<vmem>>, vector<1x32xf32>
    %159 = vector.shape_cast %158 : vector<1x32xf32> to vector<32xf32>
    %cst_63 = arith.constant dense<0.000000e+00> : vector<8xf32>
    %160 = vector.multi_reduction <add>, %155, %cst_63 [1] : vector<8x32xf32> to vector<8xf32>
    %161 = vector.shape_cast %160 : vector<8xf32> to vector<8x1xf32>
    %cst_64 = arith.constant 3.200000e+01 : f32
    %162 = vector.broadcast %cst_64 : f32 to vector<8x1xf32>
    %163 = arith.divf %161, %162 : vector<8x1xf32>
    %164 = vector.broadcast %163 : vector<8x1xf32> to vector<8x32xf32>
    %165 = arith.subf %155, %164 : vector<8x32xf32>
    %166 = arith.mulf %165, %165 : vector<8x32xf32>
    %cst_65 = arith.constant dense<0.000000e+00> : vector<8xf32>
    %167 = vector.multi_reduction <add>, %166, %cst_65 [1] : vector<8x32xf32> to vector<8xf32>
    %168 = vector.shape_cast %167 : vector<8xf32> to vector<8x1xf32>
    %cst_66 = arith.constant 3.200000e+01 : f32
    %169 = vector.broadcast %cst_66 : f32 to vector<8x1xf32>
    %170 = arith.divf %168, %169 : vector<8x1xf32>
    %171 = vector.broadcast %163 : vector<8x1xf32> to vector<8x32xf32>
    %172 = arith.subf %155, %171 : vector<8x32xf32>
    %cst_67 = arith.constant 9.99999996E-13 : f32
    %173 = vector.broadcast %cst_67 : f32 to vector<8x1xf32>
    %174 = arith.addf %170, %173 : vector<8x1xf32>
    %175 = math.rsqrt %174 : vector<8x1xf32>
    %176 = vector.broadcast %175 : vector<8x1xf32> to vector<8x32xf32>
    %177 = arith.mulf %172, %176 : vector<8x32xf32>
    %178 = vector.shape_cast %157 : vector<32xf32> to vector<1x32xf32>
    %179 = vector.broadcast %178 : vector<1x32xf32> to vector<8x32xf32>
    %180 = arith.mulf %177, %179 : vector<8x32xf32>
    %181 = vector.shape_cast %159 : vector<32xf32> to vector<1x32xf32>
    %182 = vector.broadcast %181 : vector<1x32xf32> to vector<8x32xf32>
    %183 = arith.addf %180, %182 : vector<8x32xf32>
    %c0_68 = arith.constant 0 : index
    %c0_69 = arith.constant 0 : index
    %c0_70 = arith.constant 0 : index
    %184 = vector.load %arg19[%c0_68, %c0_69, %c0_70] : memref<1x8x32xf32, #tpu.memory_space<vmem>>, vector<1x8x32xf32>
    %185 = vector.shape_cast %184 : vector<1x8x32xf32> to vector<8x32xf32>
    %186 = vector.shape_cast %183 : vector<8x32xf32> to vector<1x8x32xf32>
    tpu.vector_store %arg19[%c0_68, %c0_69, %c0_70], %186 {strides = array<i32>} : memref<1x8x32xf32, #tpu.memory_space<vmem>>, vector<1x8x32xf32>,
    return
  }
  func.func @transform_0(%arg0: i32, %arg1: i32) -> (i32, i32, i32) {
    %c0_i32 = arith.constant 0 : i32
    %c0_i32_0 = arith.constant 0 : i32
    return %arg0, %arg1, %c0_i32 : i32, i32, i32
  }
  func.func @transform_1(%arg0: i32, %arg1: i32) -> (i32, i32, i32) {
    %c0_i32 = arith.constant 0 : i32
    %c0_i32_0 = arith.constant 0 : i32
    %c0_i32_1 = arith.constant 0 : i32
    return %arg0, %c0_i32, %c0_i32_0 : i32, i32, i32
  }
  func.func @transform_2(%arg0: i32, %arg1: i32) -> (i32, i32, i32) {
    %c0_i32 = arith.constant 0 : i32
    %c0_i32_0 = arith.constant 0 : i32
    return %arg0, %arg1, %c0_i32 : i32, i32, i32
  }
  func.func @transform_3(%arg0: i32, %arg1: i32) -> (i32, i32) {
    %c0_i32 = arith.constant 0 : i32
    %c0_i32_0 = arith.constant 0 : i32
    %c0_i32_1 = arith.constant 0 : i32
    return %c0_i32, %c0_i32_0 : i32, i32
  }
  func.func @transform_4(%arg0: i32, %arg1: i32) -> (i32, i32) {
    %c0_i32 = arith.constant 0 : i32
    %c0_i32_0 = arith.constant 0 : i32
    %c0_i32_1 = arith.constant 0 : i32
    return %c0_i32, %c0_i32_0 : i32, i32
  }
  func.func @transform_5(%arg0: i32, %arg1: i32) -> (i32, i32) {
    %c0_i32 = arith.constant 0 : i32
    %c0_i32_0 = arith.constant 0 : i32
    %c0_i32_1 = arith.constant 0 : i32
    return %c0_i32, %c0_i32_0 : i32, i32
  }
  func.func @transform_6(%arg0: i32, %arg1: i32) -> (i32, i32) {
    %c0_i32 = arith.constant 0 : i32
    %c0_i32_0 = arith.constant 0 : i32
    %c0_i32_1 = arith.constant 0 : i32
    return %c0_i32, %c0_i32_0 : i32, i32
  }
  func.func @transform_7(%arg0: i32, %arg1: i32) -> (i32, i32) {
    %c0_i32 = arith.constant 0 : i32
    %c0_i32_0 = arith.constant 0 : i32
    %c0_i32_1 = arith.constant 0 : i32
    return %c0_i32, %c0_i32_0 : i32, i32
  }
  func.func @transform_8(%arg0: i32, %arg1: i32) -> (i32, i32) {
    %c0_i32 = arith.constant 0 : i32
    %c0_i32_0 = arith.constant 0 : i32
    %c0_i32_1 = arith.constant 0 : i32
    return %c0_i32, %c0_i32_0 : i32, i32
  }
  func.func @transform_9(%arg0: i32, %arg1: i32) -> (i32, i32) {
    %c0_i32 = arith.constant 0 : i32
    %c0_i32_0 = arith.constant 0 : i32
    %c0_i32_1 = arith.constant 0 : i32
    return %c0_i32, %c0_i32_0 : i32, i32
  }
  func.func @transform_10(%arg0: i32, %arg1: i32) -> (i32, i32) {
    %c0_i32 = arith.constant 0 : i32
    %c0_i32_0 = arith.constant 0 : i32
    %c0_i32_1 = arith.constant 0 : i32
    return %c0_i32, %c0_i32_0 : i32, i32
  }
  func.func @transform_11(%arg0: i32, %arg1: i32) -> (i32, i32) {
    %c0_i32 = arith.constant 0 : i32
    %c0_i32_0 = arith.constant 0 : i32
    %c0_i32_1 = arith.constant 0 : i32
    return %c0_i32, %c0_i32_0 : i32, i32
  }
  func.func @transform_12(%arg0: i32, %arg1: i32) -> (i32, i32) {
    %c0_i32 = arith.constant 0 : i32
    %c0_i32_0 = arith.constant 0 : i32
    %c0_i32_1 = arith.constant 0 : i32
    return %c0_i32, %c0_i32_0 : i32, i32
  }
  func.func @transform_13(%arg0: i32, %arg1: i32) -> (i32, i32) {
    %c0_i32 = arith.constant 0 : i32
    %c0_i32_0 = arith.constant 0 : i32
    %c0_i32_1 = arith.constant 0 : i32
    return %c0_i32, %c0_i32_0 : i32, i32
  }
  func.func @transform_14(%arg0: i32, %arg1: i32) -> (i32, i32) {
    %c0_i32 = arith.constant 0 : i32
    %c0_i32_0 = arith.constant 0 : i32
    %c0_i32_1 = arith.constant 0 : i32
    return %c0_i32, %c0_i32_0 : i32, i32
  }
  func.func @transform_15(%arg0: i32, %arg1: i32) -> (i32, i32) {
    %c0_i32 = arith.constant 0 : i32
    %c0_i32_0 = arith.constant 0 : i32
    %c0_i32_1 = arith.constant 0 : i32
    return %c0_i32, %c0_i32_0 : i32, i32
  }
  func.func @transform_16(%arg0: i32, %arg1: i32) -> (i32, i32) {
    %c0_i32 = arith.constant 0 : i32
    %c0_i32_0 = arith.constant 0 : i32
    %c0_i32_1 = arith.constant 0 : i32
    return %c0_i32, %c0_i32_0 : i32, i32
  }
  func.func @transform_17(%arg0: i32, %arg1: i32) -> (i32, i32, i32) {
    %c0_i32 = arith.constant 0 : i32
    %c0_i32_0 = arith.constant 0 : i32
    return %arg0, %arg1, %c0_i32 : i32, i32, i32
  }
}

</mosaic_0001>

<bundles_post_ra>
// kernel: tpu_custom_call.1
= control target key start
LH: loop header
LB: loop body
LE: loop exit
PB: predicated region body
PF: predicated region fallthrough
CT: control target
= control target key end

     0   :  { %s2836_s0 = inlined_call_operand.vmem [shape: f32[2,8,32], index: 0, kind: input, shape index: {}]   ;;  %s2837_s1 = inlined_call_operand.vmem [shape: f32[2,8,32], index: 1, kind: input, shape index: {}]   ;;  %s2838_s2 = inlined_call_operand.vmem [shape: f32[2,8,8], index: 2, kind: input, shape index: {}]   ;;  %s2839_s3 = inlined_call_operand.hbm [shape: bf16[32,32], index: 3, kind: input, shape index: {}]   ;;  %s2840_s4 = inlined_call_operand.vmem [shape: f32[1,32], index: 4, kind: input, shape index: {}]   ;;  %s2841_s5 = inlined_call_operand.hbm [shape: bf16[32,64], index: 5, kind: input, shape index: {}]   ;;  %s2842_s6 = inlined_call_operand.vmem [shape: f32[1,64], index: 6, kind: input, shape index: {}]   ;;  %s2843_s7 = inlined_call_operand.hbm [shape: bf16[32,32], index: 7, kind: input, shape index: {}]   ;;  %s2844_s8 = inlined_call_operand.hbm [shape: f32[1,32], index: 8, kind: input, shape index: {}]   ;;  %s2845_s9 = inlined_call_operand.hbm [shape: f32[1,32], index: 9, kind: input, shape index: {}]   ;;  %s2846_s10 = inlined_call_operand.vmem [shape: f32[1,32], index: 10, kind: input, shape index: {}]   ;;  %s2847_s11 = inlined_call_operand.vmem [shape: bf16[32,64], index: 11, kind: input, shape index: {}]   ;;  %s2848_s12 = inlined_call_operand.vmem [shape: f32[1,64], index: 12, kind: input, shape index: {}]   ;;  %s2849_s13 = inlined_call_operand.vmem [shape: bf16[64,32], index: 13, kind: input, shape index: {}]   ;;  %s2850_s14 = inlined_call_operand.vmem [shape: f32[1,32], index: 14, kind: input, shape index: {}]   ;;  %s2851_s15 = inlined_call_operand.vmem [shape: f32[1,32], index: 15, kind: input, shape index: {}]   ;;  %s2852_s16 = inlined_call_operand.vmem [shape: f32[1,32], index: 16, kind: input, shape index: {}]   ;;  %s2853_s17 = inlined_call_operand.hbm [shape: f32[2,8,32], index: 17, kind: output, shape index: {}]  }
   0x1   :  { %2873 = sst [smem:[#allocation27_spill]] %s2836_s0 }
   0x2   :  { %2874 = sst [smem:[#allocation28_spill]] %s2837_s1 }
   0x3   :  { %2875 = sst [smem:[#allocation29_spill]] %s2839_s3 }
   0x4   :  { %2876 = sst [smem:[#allocation30_spill]] %s2851_s15 }
   0x5   :  { %2877 = sst [smem:[#allocation31_spill]] %s2852_s16 }
   0x6   :  { %2878 = sst [smem:[#allocation32_spill]] %s2853_s17 }
   0x7   :  { %22 = vsyncpa [#allocation5], 0 }
   0x8   :  { %23 = vsyncpa [#allocation8], 0 }
   0x9   :  { %24 = vsyncpa [#allocation11], 0 }
   0xa   :  { %25 = vsyncpa [#allocation6], 0 }
   0xb   :  { %27 = vsyncpa [#allocation6 + $0x1], 0  ;;  %s2431_s24 = smov 0   ;;  %s2433_s25 = smov 0  }
   0xc   :  { %s2435_s26 = smov 0   ;;  %s2437_s27 = smov 0  }
   0xd   :  { %s2439_s28 = smov 0   ;;  %s2441_s29 = smov 0  }
   0xe LB: > { %2879 = sst [smem:[#allocation18_spill]] %s2302_s24  ;;  %s1753_s0 = sadd.s32 4294967295, %s2322_s29   ;;  %s2322_s29 = sphi %s2441_s29, %s33_s29   ;;  %s2318_s28 = sphi %s2439_s28, %s2915_s28   ;;  %s2314_s27 = sphi %s2437_s27, %s2914_s27   ;;  %s2310_s26 = sphi %s2435_s26, %s2913_s26   ;;  %s2306_s25 = sphi %s2433_s25, %s2912_s25   ;;  %s2302_s24 = sphi %s2431_s24, %s2911_s24  }
   0xf   : > { %2880 = sst [smem:[#allocation19_spill]] %s2306_s25  ;;  %s1754_s30 = sadd.s32 4294967294, %s2322_s29  }
  0x10   : > { %2881 = sst [smem:[#allocation20_spill]] %s2310_s26  ;;  %s45_s18 = sadd.s32 1, %s2318_s28 }
  0x11   : > { %2882 = sst [smem:[#allocation21_spill]] %s2318_s28  ;;  %s430_s19 = sadd.s32 1, %s2310_s26 }
  0x12   : > { %2883 = sst [smem:[#allocation22_spill]] %s2322_s29  ;;  %p47_p0 = scmp.ge.s32.totalorder %s45_s18, 2 }
  0x13   : > { %p440_p1 = scmp.ne.s32.totalorder %s2310_s26, %s2306_s25  ;;  %p441_p2 = scmp.eq.s32.totalorder %s1753_s0, 1 }
  0x14   : > { %p446_p3 = scmp.ne.s32.totalorder %s2306_s25, %s2302_s24  ;;  %s2917_s18 = smov (%p47_p0, %s45_s18), 0 }
  0x15   : > { %2884 = sst [smem:[#allocation23_spill]] %s2917_s18  ;;  %p2471_p4 = por %p441_p2, %p440_p1 }
  0x16   : > { %p447_p5 = scmp.eq.s32.totalorder %s1754_s30, 1  ;;  %s425_s20 = ssub.s32 %s2318_s28, %s2917_s18 }
  0x17   : > { %s2885_s1 = scalar_select %p2471_p4, 1, 0 }
  0x18   : > { %p1755_p6 = scmp.ge.s32.totalorder %s2322_s29, 1  ;;  %p428_p7 = scmp.eq.s32.totalorder %s425_s20, 0 }
  0x19   : > { %2886 = sst [smem:[#allocation24_spill]] %s2885_s1  ;;  %p2478_p8 = por %p447_p5, %p446_p3 }
  0x1a   : > { %p454_p9 = scmp.lt.s32.totalorder %s2322_s29, 3  ;;  %p2490_p11 = scmp.eq.s32.totalorder %s1753_s0, 0 }
  0x1b   : > { %s2887_s21 = scalar_select %p2478_p8, 1, 0 }
  0x1c   : > { %s2484_s22 = scalar_select %p428_p7, %s2310_s26, %s430_s19  }
  0x1d   : > { %2888 = sst [smem:[#allocation25_spill]] %s2887_s21  ;;  %p2486_p10 = pnand %p1755_p6, %p454_p9 }
  0x1e   : > { %2889 = sst [smem:[#allocation26_spill]] %s2484_s22  ;;  %s2324_s30 = smov [#allocation7]  }
  0x1f   : > { %s2890_s23 = scalar_select %p2486_p10, 1, 0 }
  0x20   : > { %s2891_s24 = scalar_select %p2490_p11, 1, 0 }
  0x21   : > { %p1961_p12 = pneg %p2486_p10  ;;  %s482_s20 = sshll.u32 %s2324_s30, 4  ;;  %s483_s20 = int_to_ptr.vmem [resolvable:$true] %s482_s20 }
  0x22   : > { %s2325_s19 = smov [#allocation10]   ;;  %s2092_s26 = scalar_lea.hbm %s2841_s5, 256 }
  0x23   : > { %p2498_p13 = pnand %p2490_p11, %p1961_p12  ;;  %s512_s28 = sshll.u32 %s2325_s19, 4  ;;  %s2502_s28 = int_to_ptr.vmem [resolvable:$true] %s512_s28 }
  0x24   : > { %p2093_p0 = scmp.ne.s32.totalorder %s2841_s5, %s2092_s26  ;;  %p2099_p5 = scmp.lt.u32.totalorder %s2092_s26, %s2841_s5 }
  0x25   : > { %p2512_p1 = pneg %p2498_p13 }
  0x27   : > { %p2095_p2 = pnand %p2512_p1, %p2093_p0 }
  0x29   : > { %p2096_p3 = pneg %p2095_p2 }
  0x2b   : > { %p2101_p6 = pnand %p2099_p5, %p2096_p3 }
  0x2d   : > { %2104 = shalt.err (!%p2101_p6)
}
  0x2e   : > { %s2105_s22 = scalar_lea.vmem %s483_s20, 256  ;;  %p2113_p8 = scmp.lt.s32.totalorder %s483_s20, %s483_s20 }
  0x2f   : > { %p2106_p7 = scmp.ne.s32.totalorder %s483_s20, %s2105_s22  ;;  %p2114_p4 = scmp.lt.s32.totalorder %s2105_s22, %s2105_s22 }
  0x31   : > { %p2108_p9 = pnand %p2106_p7, %p2512_p1  ;;  %p2115_p11 = por %p2114_p4, %p2113_p8 }
  0x33   : > { %p2109_p12 = pneg %p2108_p9 }
  0x35   : > { %p2116_p10 = pnand %p2115_p11, %p2109_p12 }
  0x37   : > { %2119 = shalt.err (!%p2116_p10)
}
  0x38   : > { %s2869_s29 = smov 64   ;;  %s2871_s21 = smov 4  }
  0x39   : > { %1967 = dma.hbm_to_vmem [thread:$0]  (!%p2498_p13), %s2841_s5, 256, %s483_s20, [#allocation8], %s2869_s29, %s2869_s29, %s2871_s21  }
  0x3a   : > { %s2120_s16 = scalar_lea.hbm %s2844_s8, 16 }
  0x3b   : > { %p2121_p4 = scmp.ne.s32.totalorder %s2844_s8, %s2120_s16  ;;  %p2127_p11 = scmp.lt.u32.totalorder %s2120_s16, %s2844_s8 }
  0x3d   : > { %p2123_p8 = pnand %p2121_p4, %p2512_p1 }
  0x3f   : > { %p2124_p10 = pneg %p2123_p8 }
  0x41   : > { %p2129_p0 = pnand %p2127_p11, %p2124_p10 }
  0x43   : > { %2132 = shalt.err (!%p2129_p0)
}
  0x44   : > { %s2133_s20 = scalar_lea.vmem %s2502_s28, 16  ;;  %s2140_s15 = scalar_lea.vmem %s2502_s28, 32 }
  0x45   : > { %p2134_p2 = scmp.ne.s32.totalorder %s2502_s28, %s2133_s20  ;;  %p2141_p6 = scmp.lt.s32.totalorder %s2502_s28, %s2502_s28 }
  0x46   : > { %p2142_p7 = scmp.lt.s32.totalorder %s2140_s15, %s2133_s20 }
  0x47   : > { %p2136_p3 = pnand %p2134_p2, %p2512_p1 }
  0x48   : > { %p2143_p9 = por %p2142_p7, %p2141_p6 }
  0x49   : > { %p2137_p5 = pneg %p2136_p3 }
  0x4b   : > { %p2144_p12 = pnand %p2143_p9, %p2137_p5 }
  0x4d   : > { %2147 = shalt.err (!%p2144_p12)
}
  0x4e   : > { %1973 = dma.hbm_to_vmem [thread:$0]  (!%p2498_p13), %s2844_s8, 16, %s2502_s28, [#allocation11]  }
  0x4f   : > { %s2328_s1 = smov [#allocation4]   ;;  %s2329_s26 = smov [#allocation9]  }
  0x50   : > { %s466_s17 = sshll.u32 %s2328_s1, 4  ;;  %s498_s0 = sshll.u32 %s2329_s26, 4  ;;  %s467_s17 = int_to_ptr.vmem [resolvable:$true] %s466_s17  ;;  %s499_s0 = int_to_ptr.vmem [resolvable:$true] %s498_s0 }
  0x51   : > { %s2894_s3 = sld [smem:[#allocation29_spill]] }
  0x57   : > { %s2148_s20 = scalar_lea.hbm %s2894_s3, 256 }
  0x58   : > { %p2149_p4 = scmp.ne.s32.totalorder %s2894_s3, %s2148_s20  ;;  %p2155_p11 = scmp.lt.u32.totalorder %s2148_s20, %s2894_s3 }
  0x5a   : > { %p2151_p8 = pnand %p2149_p4, %p2512_p1 }
  0x5c   : > { %p2152_p10 = pneg %p2151_p8 }
  0x5e   : > { %p2157_p0 = pnand %p2155_p11, %p2152_p10 }
  0x60   : > { %2160 = shalt.err (!%p2157_p0)
}
  0x61   : > { %s2161_s28 = scalar_lea.vmem %s467_s17, 256  ;;  %p2169_p6 = scmp.lt.s32.totalorder %s467_s17, %s467_s17 }
  0x62   : > { %p2162_p2 = scmp.ne.s32.totalorder %s467_s17, %s2161_s28  ;;  %p2170_p7 = scmp.lt.s32.totalorder %s2161_s28, %s2161_s28 }
  0x64   : > { %p2164_p3 = pnand %p2162_p2, %p2512_p1  ;;  %p2171_p9 = por %p2170_p7, %p2169_p6 }
  0x66   : > { %p2165_p5 = pneg %p2164_p3 }
  0x68   : > { %p2172_p12 = pnand %p2171_p9, %p2165_p5 }
  0x6a   : > { %2175 = shalt.err (!%p2172_p12)
}
  0x6b   : > { %s2895_s29 = smov 4   ;;  %s2896_s25 = smov 64  }
  0x6c   : > { %1964 = dma.hbm_to_vmem [thread:$0]  (!%p2498_p13), %s2894_s3, 256, %s467_s17, [#allocation5], %s2896_s25, %s2896_s25, %s2895_s29  }
  0x6d   : > { %s2176_s22 = scalar_lea.hbm %s2843_s7, 256 }
  0x6e   : > { %p2177_p4 = scmp.ne.s32.totalorder %s2843_s7, %s2176_s22  ;;  %p2183_p11 = scmp.lt.u32.totalorder %s2176_s22, %s2843_s7 }
  0x70   : > { %p2179_p8 = pnand %p2177_p4, %p2512_p1 }
  0x72   : > { %p2180_p10 = pneg %p2179_p8 }
  0x74   : > { %p2185_p0 = pnand %p2183_p11, %p2180_p10 }
  0x76   : > { %2188 = shalt.err (!%p2185_p0)
}
  0x77   : > { %s2189_s21 = scalar_lea.vmem %s499_s0, 256  ;;  %p2197_p6 = scmp.lt.s32.totalorder %s499_s0, %s499_s0 }
  0x78   : > { %p2190_p2 = scmp.ne.s32.totalorder %s499_s0, %s2189_s21  ;;  %p2198_p7 = scmp.lt.s32.totalorder %s2189_s21, %s2189_s21 }
  0x7a   : > { %p2192_p3 = pnand %p2190_p2, %p2512_p1  ;;  %p2199_p9 = por %p2198_p7, %p2197_p6 }
  0x7c   : > { %p2193_p5 = pneg %p2192_p3 }
  0x7e   : > { %p2200_p12 = pnand %p2199_p9, %p2193_p5 }
  0x80   : > { %2203 = shalt.err (!%p2200_p12)
}
  0x81   : > { %1970 = dma.hbm_to_vmem [thread:$0]  (!%p2498_p13), %s2843_s7, 256, %s499_s0, [#allocation8], %s2896_s25, %s2896_s25, %s2895_s29  }
  0x82   : > { %s2330_s26 = smov [#allocation12]   ;;  %s2204_s15 = scalar_lea.hbm %s2845_s9, 16 }
  0x83   : > { %s523_s19 = sshll.u32 %s2330_s26, 4  ;;  %p2205_p4 = scmp.ne.s32.totalorder %s2845_s9, %s2204_s15  ;;  %s524_s19 = int_to_ptr.vmem [resolvable:$true] %s523_s19 }
  0x84   : > { %p2211_p11 = scmp.lt.u32.totalorder %s2204_s15, %s2845_s9 }
  0x85   : > { %p2207_p8 = pnand %p2205_p4, %p2512_p1 }
  0x87   : > { %p2208_p10 = pneg %p2207_p8 }
  0x89   : > { %p2213_p0 = pnand %p2211_p11, %p2208_p10 }
  0x8b   : > { %2216 = shalt.err (!%p2213_p0)
}
  0x8c   : > { %s2217_s0 = scalar_lea.vmem %s524_s19, 16  ;;  %s2224_s29 = scalar_lea.vmem %s524_s19, 32 }
  0x8d   : > { %p2218_p2 = scmp.ne.s32.totalorder %s524_s19, %s2217_s0  ;;  %p2225_p6 = scmp.lt.s32.totalorder %s524_s19, %s524_s19 }
  0x8e   : > { %p2226_p7 = scmp.lt.s32.totalorder %s2224_s29, %s2217_s0 }
  0x8f   : > { %p2220_p3 = pnand %p2218_p2, %p2512_p1 }
  0x90   : > { %p2227_p9 = por %p2226_p7, %p2225_p6 }
  0x91   : > { %p2221_p5 = pneg %p2220_p3 }
  0x93   : > { %p2228_p12 = pnand %p2227_p9, %p2221_p5 }
  0x95   : > { %2231 = shalt.err (!%p2228_p12)
}
  0x96   : > { %1976 = dma.hbm_to_vmem [thread:$0]  (!%p2498_p13), %s2845_s9, 16, %s524_s19, [#allocation11]  }
  0x97   : > { %p2897_p4 = scmp.ne.s32.totalorder %s2890_s23, 0 }
  0x98   : > { %p2898_p8 = scmp.ne.s32.totalorder (!%p2897_p4), %s2891_s24, 0 }
  0x99   : > { %584 = sbr.rel (%p2897_p4) target bundleno = 2718 (0xa9e), region = 88 }
  0xa0   : > { %2285 = dma.done.wait (%p2898_p8), [#allocation5], 256  }
  0xa1   : > { %2287 = vsyncadd (%p2898_p8), [#allocation5], 4294967040 }
  0xa2   : > { %2289 = dma.done.wait (%p2898_p8), [#allocation8], 512  }
  0xa3   : > { %2291 = vsyncadd (%p2898_p8), [#allocation8], 4294966784 }
  0xa4   : > { %2293 = dma.done.wait (%p2898_p8), [#allocation11], 32  }
  0xa5   : > { %2295 = vsyncadd (%p2898_p8), [#allocation11], 4294967264  ;;  %p665_p13 = scmp.lt.s32.totalorder %s2314_s27, 1  ;;  %v2331_v0 = vmov 0.0   ;;  %vm2332_vm0 = vmmov 0   ;;  %s2899_s30 = sld [smem:[#allocation28_spill]] }
  0xa6   : > { %1847 = vmatprep.subr.bf16.mxu1 %v2331_v0  ;;  %1851 = vmatprep.mubr.msk.bf16.mxu1 %vm2332_vm0, %v2331_v0  ;;  %v2056_v1 = vld [vmem:[#allocation7] sm:$0xff]   ;;  %v2057_v2 = vld [vmem:[#allocation7 + $0x8] sm:$0xff]   ;;  %vm713_vm1 = vcmask 261120   ;;  %v2058_v4 = vld [vmem:[#allocation4] sm:$0xff]   ;;  %s2900_s22 = sld [smem:[#allocation27_spill]]  ;;  %vm758_vm2 = vcmask 257024  }
  0xa7   : > { %s666_s3 = scalar_select %p665_p13, %s2314_s27, 1  ;;  %1863 = vmatprep.subr.bf16.mxu0 %v2331_v0  ;;  %1865 = vmatprep.mubr.msk.bf16.mxu0 %vm2332_vm0, %v2331_v0  ;;  %v2059_v6 = vld [vmem:[#allocation4 + $0x8] sm:$0xff]   ;;  %v1772_v9 = vld [vmem:[%s2842_s6] ss:$0 sm:$0xff]  ;;  %vm841_vm3 = vcmask 64512   ;;  %vm903_vm4 = vcmask 1043456  }
  0xa8   : > { %1848 = vmatpush3.bf16.msra.mxu1 %v2056_v1  ;;  %v1777_v16 = vld [vmem:[%s2840_s4] ss:$0 sm:$0xff]  ;;  %s2333_s0 = smov 112   ;;  %s2334_s29 = smov 120   ;;  %vm1297_vm5 = vcmask 130048   ;;  %vm1299_vm6 = vcmask 195584  }
  0xa9   : > { %s2637_s18 = sshll.u32 %s666_s3, 3  ;;  %1849 = vmatprep.subr.bf16.mxu1 %v2331_v0  ;;  %s2335_s25 = smov 104   ;;  %vm1515_vm7 = vcmask 523264  }
  0xaa   : > { %s682_s24 = scalar_lea.vmem %s2838_s2, %s2637_s18  ;;  %s2337_s23 = smov 8  }
  0xab   : > { %s675_s1 = scalar_lea.vmem %s2899_s30, %s2637_s18  ;;  %v769_v36 = vld [vmem:[%s682_s24] sm:$0xff]  ;;  %s2338_s30 = smov 16  }
  0xac   : > { %v688_v3 = vld [vmem:[%s675_s1] sm:$0xff]  ;;  %1850 = vmatpush3.bf16.msra.mxu1 %v2057_v2  ;;  %s671_s20 = scalar_lea.vmem %s2900_s22, %s2637_s18  ;;  %s2336_s18 = smov 96  }
  0xad   : > { %v689_v5 = vpack.c.bf16 %v688_v3, %v688_v3  ;;  %1855 = vmatprep.subr.bf16.mxu1 %v2331_v0  ;;  %v2652_v7 = vld [vmem:[%s671_s20] sm:$0xff]  ;;  %s2339_s1 = smov 24   ;;  %s2901_s26 = sld [smem:[#allocation19_spill]] }
  0xae   : > { %v768_v8 = vpack.c.bf16 %v2652_v7, %v2652_v7  ;;  %s2902_s20 = sld [smem:[#allocation24_spill]]  ;;  %s2903_s28 = sld [smem:[#allocation30_spill]] }
  0xaf   : > { %1852 = vmatmul.mubr.msk.bf16.vlgmr.msra.gmra.mrb[0].mxu1 %vm713_vm1, %v689_v5 }
  0xb0   : > { %1856 = vmatpush3.bf16.msra.mxu1 %v2058_v4  ;;  %1859 = vmatprep.mubr.msk.bf16.mxu1 %vm2332_vm0, %v2331_v0 }
  0xb1   : > { %1857 = vmatprep.subr.bf16.mxu1 %v2331_v0 }
  0xb3   : > { %s662_s19 = sand.u32 1, %s2901_s26  }
  0xb4   : > { %1858 = vmatpush3.bf16.msra.mxu1 %v2059_v6  ;;  %s1768_s22 = sshll.u32 %s662_s19, 3  ;;  %p2906_p10 = scmp.ne.s32.totalorder %s2902_s20, 0 }
  0xb5   : > { %1869 = vmatprep.subr.bf16.mxu1 %v2331_v0  ;;  %s664_s17 = scalar_lea.vmem [#allocation13], %s1768_s22 }
  0xb6   : > { %s1605_s3 = sshll.u32 %s664_s17, 4  ;;  %s2790_s3 = int_to_ptr.vmem [resolvable:$true] %s1605_s3 }
  0xb7   : > { %1860 = vmatmul.mubr.msk.bf16.vlgmr.msra.gmra.mrb[4].mxu1 %vm713_vm1, %v768_v8  ;;  %s2232_s26 = scalar_lea.vmem %s2790_s3, 128 }
  0xb8   : > { %1871 = vmatprep.mubr.msk.bf16.mxu1 %vm2332_vm0, %v2331_v0  ;;  %p2233_p1 = scmp.ne.s32.totalorder %s2790_s3, %s2232_s26 }
  0xba   : > { %p2234_p11 = pnand %p2233_p1, %p2906_p10 }
  0xbc   : > { %p2235_p0 = pneg %p2234_p11 }
 0x182   : > { %v751_v10 = vpop.f32.mrb[0].mxu1 }
 0x183   : > { %v752_v11 = vadd.f32 %v1772_v9, %v751_v10  ;;  %v1853_v12 = vpop.f32.mrb[1].mxu1 }
 0x184   : > { %v754_v13 = vpop.f32.mrb[2].mxu1 }
 0x185   : > { %v2664_v14 = vpack.c.bf16 %v752_v11, %v752_v11  ;;  %v1854_v15 = vpop.f32.mrb[3].mxu1 }
 0x187   : > { %759 = vst.msk [vmem:[#allocation2] sm:$0xf] %vm758_vm2, %v2664_v14 }
 0x18a   : > { %v831_v17 = vpop.f32.mrb[4].mxu1 }
 0x18b   : > { %v832_v18 = vadd.f32 %v1777_v16, %v831_v17  ;;  %v1861_v19 = vpop.f32.mrb[5].mxu1 }
 0x18c   : > { %v834_v20 = vpop.f32.mrb[6].mxu1 }
 0x18d   : > { %v837_v21 = vmul.f32 0.35355338, %v832_v18  ;;  %v1862_v22 = vpop.f32.mrb[7].mxu1 }
 0x18e   : > { %v839_v23 = vld [vmem:[#allocation2] sm:$0xf] }
 0x18f   : > { %v846_v24 = vsel %vm841_vm3, %v839_v23, 0  ;;  %v1783_v25 = vcombine.low %v839_v23, %v839_v23  ;;  %v838_v26 = vpack.c.bf16 %v837_v21, %v837_v21 }
 0x190   : > { %1864 = vmatpush3.bf16.xpose.msra.mxu0 %v846_v24 }
 0x191   : > { %1066 = vrot.lane.b32.xlu1 %v1783_v25, %s2333_s0  ;;  %953 = vrot.lane.b32.xlu0 %v1783_v25, %s2334_s29 }
 0x192   : > { %1875 = vmatprep.subr.bf16.mxu0 %v2331_v0 }
 0x195   : > { %1064 = vrot.lane.b32.xlu1 %v838_v26, %s2333_s0  ;;  %948 = vrot.lane.b32.xlu0 %v838_v26, %s2334_s29 }
 0x197   : > { %1866 = vmatmul.mubr.msk.bf16.vlgmr.msra.gmra.mrb[0].mxu0 %vm841_vm3, %v838_v26 }
 0x198   : > { %1877 = vmatprep.mubr.msk.bf16.mxu0 %vm2332_vm0, %v2331_v0 }
 0x199   : > { %1174 = vrot.lane.b32.xlu1 %v838_v26, %s2335_s25  ;;  %1176 = vrot.lane.b32.xlu0 %v1783_v25, %s2335_s25 }
 0x203   : > { %v954_v27 = vpop.permute.xlu0 %953  ;;  %v1067_v29 = vpop.permute.xlu1 %1066 }
 0x204   : > { %v959_v28 = vsel %vm841_vm3, %v954_v27, 0  ;;  %v1072_v31 = vsel %vm841_vm3, %v1067_v29, 0 }
 0x205   : > { %1876 = vmatpush3.bf16.xpose.msra.mxu0 %v959_v28 }
 0x206   : > { %1887 = vmatprep.subr.bf16.mxu0 %v2331_v0 }
 0x207   : > { %v949_v30 = vpop.permute.xlu0 %948  ;;  %v1065_v33 = vpop.permute.xlu1 %1064 }
 0x20b   : > { %v1177_v32 = vpop.permute.xlu0 %1176  ;;  %v1175_v35 = vpop.permute.xlu1 %1174 }
 0x20c   : > { %1878 = vmatmul.mubr.msk.bf16.vlgmr.msra.gmra.mrb[4].mxu0 %vm841_vm3, %v949_v30  ;;  %v1182_v34 = vsel %vm841_vm3, %v1177_v32, 0 }
 0x20d   : > { %1888 = vmatpush3.bf16.xpose.msra.mxu0 %v1072_v31  ;;  %1889 = vmatprep.mubr.msk.bf16.mxu0 %vm2332_vm0, %v2331_v0 }
 0x20e   : > { %1899 = vmatprep.subr.bf16.mxu0 %v2331_v0 }
 0x214   : > { %1890 = vmatmul.mubr.msk.bf16.vlgmr.msra.gmra.mrb[8].mxu0 %vm841_vm3, %v1065_v33 }
 0x215   : > { %1900 = vmatpush3.bf16.xpose.msra.mxu0 %v1182_v34  ;;  %1901 = vmatprep.mubr.msk.bf16.mxu0 %vm2332_vm0, %v2331_v0 }
 0x216   : > { %1911 = vmatprep.subr.bf16.mxu0 %v2331_v0 }
 0x21c   : > { %1902 = vmatmul.mubr.msk.bf16.vlgmr.msra.gmra.mrb[12].mxu0 %vm841_vm3, %v1175_v35 }
 0x21d   : > { %1915 = vmatprep.mubr.msk.bf16.mxu0 %vm2332_vm0, %v2331_v0 }
 0x26a   : > { %v882_v37 = vpop.f32.mrb[0].mxu0 }
 0x26b   : > { %v883_v38 = vadd.f32 %v882_v37, %v769_v36  ;;  %v1867_v39 = vpop.f32.mrb[1].mxu0 }
 0x26c   : > { %v885_v40 = vpop.f32.mrb[2].mxu0 }
 0x26d   : > { %v1868_v41 = vpop.f32.mrb[3].mxu0  ;;  %v888_v42 = vsel %vm841_vm3, %v883_v38, -inf }
 0x26e   : > { %889 = vmax.xlane.f32.xlu0 %v888_v42 }
 0x2df   : > { %v995_v43 = vpop.f32.mrb[4].mxu0 }
 0x2e0   : > { %v996_v44 = vadd.f32 %v995_v43, %v769_v36  ;;  %v1879_v45 = vpop.f32.mrb[5].mxu0 }
 0x2e1   : > { %v998_v46 = vpop.f32.mrb[6].mxu0 }
 0x2e2   : > { %v1880_v47 = vpop.f32.mrb[7].mxu0  ;;  %v1001_v48 = vsel %vm841_vm3, %v996_v44, -inf }
 0x2e3   : > { %1002 = vmax.xlane.f32.xlu1 %v1001_v48 }
 0x2e7   : > { %v1108_v49 = vpop.f32.mrb[8].mxu0 }
 0x2e8   : > { %v1109_v50 = vadd.f32 %v1108_v49, %v769_v36  ;;  %v1891_v51 = vpop.f32.mrb[9].mxu0  ;;  %v2062_v49 = vld [vmem:[#allocation9] sm:$0xff]  }
 0x2e9   : > { %v1111_v52 = vpop.f32.mrb[10].mxu0  ;;  %1912 = vmatpush3.bf16.msra.mxu0 %v2062_v49 }
 0x2ea   : > { %v1892_v53 = vpop.f32.mrb[11].mxu0  ;;  %v1114_v54 = vsel %vm841_vm3, %v1109_v50, -inf  ;;  %1913 = vmatprep.subr.bf16.mxu0 %v2331_v0 }
 0x2eb   : > { %1115 = vmax.xlane.f32.xlu0 %v1114_v54  ;;  %v2063_v54 = vld [vmem:[#allocation9 + $0x8] sm:$0xff]  }
 0x2ed   : > { %1914 = vmatpush3.bf16.msra.mxu0 %v2063_v54 }
 0x2ee   : > { %1927 = vmatprep.subr.bf16.mxu0 %v2331_v0 }
 0x2ef   : > { %v1218_v55 = vpop.f32.mrb[12].mxu0 }
 0x2f0   : > { %v1219_v56 = vadd.f32 %v1218_v55, %v769_v36  ;;  %v1903_v57 = vpop.f32.mrb[13].mxu0 }
 0x2f1   : > { %v1221_v58 = vpop.f32.mrb[14].mxu0 }
 0x2f2   : > { %v1904_v59 = vpop.f32.mrb[15].mxu0  ;;  %v1224_v60 = vsel %vm841_vm3, %v1219_v56, -inf }
 0x2f3   : > { %1225 = vmax.xlane.f32.xlu0 %v1224_v60 }
 0x2f4   : > { %763 = vrot.lane.b32.xlu1 %v2664_v14, %s2336_s18 }
 0x2fb   : > { %v890_v61 = vpop.xlane.xlu0 %889 }
 0x2fc   : > { %v891_v62 = vsub.f32 %v883_v38, %v890_v61 }
 0x2fe   : > { %v892_v63 = vmul.f32 1.442695, %v891_v62 }
 0x300   : > { %2070 = vpow2.f32 %v892_v63 }
 0x30a   : > { %v2071_v1 = vpop.eup %2070 }
 0x30b   : > { %v894_v2 = vsel %vm841_vm3, %v2071_v1, 0.0 }
 0x30c   : > { %895 = vadd.xlane.f32.xlu0 %v894_v2 }
 0x370   : > { %v1003_v3 = vpop.xlane.xlu1 %1002 }
 0x371   : > { %v1004_v4 = vsub.f32 %v996_v44, %v1003_v3 }
 0x373   : > { %v1005_v5 = vmul.f32 1.442695, %v1004_v4 }
 0x374   : > { %v764_v6 = vpop.permute.xlu1 %763 }
 0x375   : > { %2072 = vpow2.f32 %v1005_v5  ;;  %766 = vst.msk [vmem:[#allocation3] sm:$0xf] %vm758_vm2, %v764_v6 }
 0x378   : > { %v1116_v8 = vpop.xlane.xlu0 %1115 }
 0x379   : > { %v1117_v9 = vsub.f32 %v1109_v50, %v1116_v8  ;;  %v1791_v8 = vld [vmem:[#allocation10] ss:$0 sm:$0xff] }
 0x37b   : > { %v1118_v10 = vmul.f32 1.442695, %v1117_v9 }
 0x37c   : > { %v840_v11 = vld [vmem:[#allocation3] sm:$0xf] }
 0x37d   : > { %2074 = vpow2.f32 %v1118_v10  ;;  %v905_v12 = vsel %vm903_vm4, %v840_v11, 0  ;;  %v1785_v13 = vcombine.low %v840_v11, %v840_v11 }
 0x37e   : > { %1870 = vmatpush3.bf16.msra.mxu1 %v905_v12 }
 0x37f   : > { %v2073_v14 = vpop.eup %2072  ;;  %1016 = vrot.lane.b32.xlu1 %v1785_v13, %s2334_s29  ;;  %1881 = vmatprep.subr.bf16.mxu1 %v2331_v0  ;;  %s2904_s29 = sld [smem:[#allocation31_spill]] }
 0x380   : > { %v1226_v15 = vpop.xlane.xlu0 %1225  ;;  %v1007_v16 = vsel %vm841_vm3, %v2073_v14, 0.0 }
 0x381   : > { %v1227_v17 = vsub.f32 %v1219_v56, %v1226_v15  ;;  %1008 = vadd.xlane.f32.xlu0 %v1007_v16 }
 0x383   : > { %v1228_v18 = vmul.f32 1.442695, %v1227_v17  ;;  %1236 = vrot.lane.b32.xlu1 %v1785_v13, %s2335_s25  ;;  %s1810_s25 = sshll.u32 %s2314_s27, 7  ;;  %s2340_s27 = smov [#allocation13]  }
 0x384   : > { %s2236_s22 = sshll.u32 %s2340_s27, 4  ;;  %s2237_s22 = int_to_ptr.vmem [resolvable:$false] %s2236_s22 }
 0x385   : > { %2076 = vpow2.f32 %v1228_v18  ;;  %s2238_s15 = scalar_lea.vmem %s2237_s22, 256  ;;  %p2239_p2 = scmp.lt.s32.totalorder %s2790_s3, %s2237_s22 }
 0x386   : > { %p2240_p3 = scmp.lt.s32.totalorder %s2238_s15, %s2232_s26 }
 0x387   : > { %v2075_v19 = vpop.eup %2074 }
 0x388   : > { %v1120_v20 = vsel %vm841_vm3, %v2075_v19, 0.0  ;;  %p2241_p5 = por %p2240_p3, %p2239_p2 }
 0x389   : > { %1121 = vadd.xlane.f32.xlu0 %v1120_v20 }
 0x38a   : > { %p2242_p6 = pnand %p2241_p5, %p2235_p0 }
 0x38f   : > { %v2077_v21 = vpop.eup %2076 }
 0x390   : > { %v1230_v22 = vsel %vm841_vm3, %v2077_v21, 0.0 }
 0x391   : > { %1231 = vadd.xlane.f32.xlu0 %v1230_v22 }
 0x399   : > { %v896_v23 = vpop.xlane.xlu0 %895 }
 0x39a   : > { %2078 = vrcp.f32 %v896_v23 }
 0x3a4   : > { %v2079_v24 = vpop.eup %2078 }
 0x3a5   : > { %v898_v25 = vmul.f32 %v2079_v24, %v2071_v1 }
 0x3a7   : > { %1126 = vrot.lane.b32.xlu0 %v1785_v13, %s2333_s0  ;;  %v899_v26 = vpack.c.bf16 %v898_v25, %v898_v25 }
 0x3a9   : > { %1872 = vmatmul.mubr.msk.bf16.vlgmr.msra.gmra.mrb[8].mxu1 %vm841_vm3, %v899_v26  ;;  %v1795_v26 = vld [vmem:[#allocation12] ss:$0 sm:$0xff] }
 0x3aa   : > { %1883 = vmatprep.mubr.msk.bf16.mxu1 %vm2332_vm0, %v2331_v0 }
 0x3f1   : > { %v1017_v27 = vpop.permute.xlu1 %1016 }
 0x3f2   : > { %v1022_v28 = vsel %vm903_vm4, %v1017_v27, 0 }
 0x3f3   : > { %1882 = vmatpush3.bf16.msra.mxu1 %v1022_v28  ;;  %v1796_v28 = vld [vmem:[%s2846_s10] ss:$0 sm:$0xff] }
 0x3f4   : > { %1893 = vmatprep.subr.bf16.mxu1 %v2331_v0 }
 0x3f5   : > { %v1237_v39 = vpop.permute.xlu1 %1236 }
 0x3f6   : > { %v1242_v41 = vsel %vm903_vm4, %v1237_v39, 0 }
 0x40e   : > { %v1009_v29 = vpop.xlane.xlu0 %1008 }
 0x40f   : > { %2080 = vrcp.f32 %v1009_v29 }
 0x416   : > { %v1122_v30 = vpop.xlane.xlu0 %1121 }
 0x417   : > { %2082 = vrcp.f32 %v1122_v30 }
 0x419   : > { %v2081_v31 = vpop.eup %2080 }
 0x41a   : > { %v1011_v32 = vmul.f32 %v2081_v31, %v2073_v14 }
 0x41c   : > { %v1012_v33 = vpack.c.bf16 %v1011_v32, %v1011_v32  ;;  %v2066_v32 = vld [vmem:[%s2849_s13] sm:$0xff]  }
 0x41e   : > { %1884 = vmatmul.mubr.msk.bf16.vlgmr.msra.gmra.mrb[12].mxu1 %vm841_vm3, %v1012_v33  ;;  %v1232_v34 = vpop.xlane.xlu0 %1231  ;;  %v2067_v33 = vld [vmem:[%s2849_s13 + $0x8] sm:$0xff]  }
 0x41f   : > { %2084 = vrcp.f32 %v1232_v34  ;;  %1895 = vmatprep.mubr.msk.bf16.mxu1 %vm2332_vm0, %v2331_v0  ;;  %v2068_v34 = vld [vmem:[%s2849_s13 + $0x10] sm:$0xff]  }
 0x421   : > { %v2083_v35 = vpop.eup %2082 }
 0x422   : > { %v1124_v36 = vmul.f32 %v2083_v35, %v2075_v19  ;;  %v1127_v37 = vpop.permute.xlu0 %1126  ;;  %v2069_v35 = vld [vmem:[%s2849_s13 + $0x18] sm:$0xff]  }
 0x423   : > { %v1132_v38 = vsel %vm903_vm4, %v1127_v37, 0 }
 0x424   : > { %1894 = vmatpush3.bf16.msra.mxu1 %v1132_v38  ;;  %v1125_v40 = vpack.c.bf16 %v1124_v36, %v1124_v36  ;;  %v1797_v36 = vld [vmem:[%s2848_s12] ss:$0 sm:$0xff] }
 0x425   : > { %1905 = vmatprep.subr.bf16.mxu1 %v2331_v0 }
 0x427   : > { %1896 = vmatmul.mubr.msk.bf16.vlgmr.msra.gmra.mrb[16].mxu1 %vm841_vm3, %v1125_v40 }
 0x428   : > { %1906 = vmatpush3.bf16.msra.mxu1 %v1242_v41  ;;  %1907 = vmatprep.mubr.msk.bf16.mxu1 %vm2332_vm0, %v2331_v0 }
 0x429   : > { %v2085_v42 = vpop.eup %2084  ;;  %1919 = vmatprep.subr.bf16.mxu1 %v2331_v0 }
 0x42a   : > { %v1234_v43 = vmul.f32 %v2085_v42, %v2077_v21  ;;  %v2064_v21 = vld [vmem:[%s2847_s11] sm:$0xff]  }
 0x42c   : > { %v1235_v44 = vpack.c.bf16 %v1234_v43, %v1234_v43 }
 0x42f   : > { %1908 = vmatmul.mubr.msk.bf16.vlgmr.msra.gmra.mrb[20].mxu1 %vm841_vm3, %v1235_v44 }
 0x430   : > { %1923 = vmatprep.mubr.msk.bf16.mxu1 %vm2332_vm0, %v2331_v0  ;;  %1920 = vmatpush3.bf16.msra.mxu1 %v2064_v21 }
 0x431   : > { %1921 = vmatprep.subr.bf16.mxu1 %v2331_v0 }
 0x47c   : > { %v941_v45 = vpop.f32.mrb[8].mxu1 }
 0x47d   : > { %v1873_v46 = vpop.f32.mrb[9].mxu1 }
 0x47e   : > { %v944_v47 = vpop.f32.mrb[10].mxu1 }
 0x47f   : > { %v1874_v48 = vpop.f32.mrb[11].mxu1 }
 0x4f1   : > { %v1058_v50 = vpop.f32.mrb[12].mxu1 }
 0x4f2   : > { %1285 = vrot.lane.b32.xlu1 %v1058_v50, %s2337_s23  ;;  %v1885_v51 = vpop.f32.mrb[13].mxu1  ;;  %s2905_s23 = sld [smem:[#allocation32_spill]] }
 0x4f3   : > { %v1061_v52 = vpop.f32.mrb[14].mxu1  ;;  %v1801_v51 = vld [vmem:[%s2850_s14] ss:$0 sm:$0xff] }
 0x4f4   : > { %v1886_v53 = vpop.f32.mrb[15].mxu1 }
 0x4fa   : > { %v1168_v55 = vpop.f32.mrb[16].mxu1 }
 0x4fb   : > { %1289 = vrot.lane.b32.xlu1 %v1168_v55, %s2338_s30  ;;  %v1897_v56 = vpop.f32.mrb[17].mxu1  ;;  %s2788_s30 = scalar_lea.hbm %s2905_s23, %s1810_s25 }
 0x4fc   : > { %v1171_v57 = vpop.f32.mrb[18].mxu1 }
 0x4fd   : > { %v1898_v58 = vpop.f32.mrb[19].mxu1 }
 0x502   : > { %v1278_v59 = vpop.f32.mrb[20].mxu1 }
 0x503   : > { %1293 = vrot.lane.b32.xlu1 %v1278_v59, %s2339_s1  ;;  %v1909_v60 = vpop.f32.mrb[21].mxu1  ;;  %s1591_s1 = scalar_lea.sflag [#allocation6], %s662_s19 }
 0x504   : > { %v1281_v61 = vpop.f32.mrb[22].mxu1 }
 0x505   : > { %v1910_v62 = vpop.f32.mrb[23].mxu1 }
 0x564   : > { %v1286_v63 = vpop.permute.xlu1 %1285 }
 0x565   : > { %v1296_v2 = vsel %vm841_vm3, %v941_v45, %v1286_v63 }
 0x56d   : > { %v1290_v1 = vpop.permute.xlu1 %1289 }
 0x56e   : > { %v1298_v3 = vsel %vm1297_vm5, %v1296_v2, %v1290_v1 }
 0x575   : > { %v1294_v4 = vpop.permute.xlu1 %1293 }
 0x576   : > { %v1300_v5 = vsel %vm1299_vm6, %v1298_v3, %v1294_v4 }
 0x577   : > { %v1301_v6 = vpack.c.bf16 %v1300_v5, %v1300_v5  ;;  %v1807_v5 = vld [vmem:[%s2903_s28] ss:$0 sm:$0xff] }
 0x579   : > { %1916 = vmatmul.mubr.msk.bf16.vlgmr.msra.gmra.mrb[16].mxu0 %vm713_vm1, %v1301_v6 }
 0x57a   : > { %1935 = vmatprep.mubr.msk.bf16.mxu0 %vm2332_vm0, %v2331_v0  ;;  %1928 = vmatpush3.bf16.msra.mxu0 %v2066_v32 }
 0x57b   : > { %1929 = vmatprep.subr.bf16.mxu0 %v2331_v0 }
 0x57e   : > { %1930 = vmatpush3.bf16.msra.mxu0 %v2067_v33 }
 0x57f   : > { %1931 = vmatprep.subr.bf16.mxu0 %v2331_v0 }
 0x582   : > { %1932 = vmatpush3.bf16.msra.mxu0 %v2068_v34 }
 0x583   : > { %1933 = vmatprep.subr.bf16.mxu0 %v2331_v0 }
 0x586   : > { %1934 = vmatpush3.bf16.msra.mxu0 %v2069_v35 }
 0x64c   : > { %v1362_v9 = vpop.f32.mrb[16].mxu0 }
 0x64d   : > { %v1363_v10 = vadd.f32 %v1791_v8, %v1362_v9  ;;  %v1917_v11 = vpop.f32.mrb[17].mxu0  ;;  %v1808_v8 = vld [vmem:[%s2904_s29] ss:$0 sm:$0xff] }
 0x64e   : > { %v1365_v12 = vpop.f32.mrb[18].mxu0 }
 0x64f   : > { %v1918_v13 = vpop.f32.mrb[19].mxu0  ;;  %v1368_v14 = vadd.f32 %v1363_v10, %v2652_v7  ;;  %v2065_v7 = vld [vmem:[%s2847_s11 + $0x8] sm:$0xff]  }
 0x650   : > { %1922 = vmatpush3.bf16.msra.mxu1 %v2065_v7 }
 0x651   : > { %v1371_v15 = vsel %vm713_vm1, %v1368_v14, 0.0 }
 0x652   : > { %1372 = vadd.xlane.f32.xlu1 %v1371_v15 }
 0x6df   : > { %v1373_v16 = vpop.xlane.xlu1 %1372 }
 0x6e0   : > { %v1375_v17 = vmul.f32 0.03125, %v1373_v16 }
 0x6e2   : > { %v1376_v18 = vsub.f32 %v1368_v14, %v1375_v17 }
 0x6e4   : > { %v1377_v19 = vmul.f32 %v1376_v18, %v1376_v18 }
 0x6e6   : > { %v1378_v20 = vsel %vm713_vm1, %v1377_v19, 0.0 }
 0x6e7   : > { %1379 = vadd.xlane.f32.xlu0 %v1378_v20 }
 0x774   : > { %v1380_v22 = vpop.xlane.xlu0 %1379 }
 0x775   : > { %v1381_v23 = vmul.f32 0.03125, %v1380_v22 }
 0x777   : > { %v1382_v24 = vadd.f32 1e-12, %v1381_v23 }
 0x779   : > { %2086 = vrsqrt.f32 %v1382_v24 }
 0x783   : > { %v2087_v25 = vpop.eup %2086 }
 0x784   : > { %v1384_v27 = vmul.f32 %v2087_v25, %v1376_v18 }
 0x786   : > { %v1391_v29 = vmul.f32 %v1795_v26, %v1384_v27 }
 0x788   : > { %v1398_v30 = vadd.f32 %v1796_v28, %v1391_v29 }
 0x78a   : > { %v1399_v31 = vpack.c.bf16 %v1398_v30, %v1398_v30 }
 0x78c   : > { %1924 = vmatmul.mubr.msk.bf16.vlgmr.msra.gmra.mrb[24].mxu1 %vm713_vm1, %v1399_v31 }
 0x85f   : > { %v1460_v37 = vpop.f32.mrb[24].mxu1 }
 0x860   : > { %v1461_v38 = vadd.f32 %v1797_v36, %v1460_v37  ;;  %v1925_v39 = vpop.f32.mrb[25].mxu1 }
 0x861   : > { %v1463_v40 = vpop.f32.mrb[26].mxu1 }
 0x862   : > { %v1466_v41 = vmul.f32 %v1461_v38, %v1461_v38  ;;  %v1926_v42 = vpop.f32.mrb[27].mxu1 }
 0x864   : > { %v1467_v43 = vmul.f32 %v1466_v41, %v1461_v38 }
 0x866   : > { %v1468_v44 = vmul.f32 0.044715, %v1467_v43 }
 0x868   : > { %v1469_v45 = vadd.f32 %v1468_v44, %v1461_v38 }
 0x86a   : > { %v1470_v46 = vmul.f32 0.7978846, %v1469_v45 }
 0x86c   : > { %2088 = vtanh.f32 %v1470_v46 }
 0x876   : > { %v2089_v0 = vpop.eup %2088 }
 0x877   : > { %v1472_v47 = vadd.f32 1.0, %v2089_v0 }
 0x879   : > { %v1473_v48 = vmul.f32 0.5, %v1472_v47 }
 0x87b   : > { %v1474_v49 = vmul.f32 %v1473_v48, %v1461_v38 }
 0x87d   : > { %v1475_v50 = vpack.c.bf16 %v1474_v49, %v1474_v49 }
 0x87f   : > { %1936 = vmatmul.mubr.msk.bf16.vlgmr.msra.gmra.mrb[20].mxu0 %vm1515_vm7, %v1475_v50 }
 0x952   : > { %v1553_v52 = vpop.f32.mrb[20].mxu0 }
 0x953   : > { %v1554_v53 = vadd.f32 %v1801_v51, %v1553_v52  ;;  %v1937_v54 = vpop.f32.mrb[21].mxu0 }
 0x954   : > { %v1556_v55 = vpop.f32.mrb[22].mxu0 }
 0x955   : > { %v1938_v56 = vpop.f32.mrb[23].mxu0  ;;  %v1559_v57 = vadd.f32 %v1554_v53, %v1398_v30 }
 0x957   : > { %v1562_v58 = vsel %vm713_vm1, %v1559_v57, 0.0 }
 0x958   : > { %1563 = vadd.xlane.f32.xlu0 %v1562_v58 }
 0x9e5   : > { %v1564_v59 = vpop.xlane.xlu0 %1563 }
 0x9e6   : > { %v1565_v60 = vmul.f32 0.03125, %v1564_v59 }
 0x9e8   : > { %v1566_v61 = vsub.f32 %v1559_v57, %v1565_v60 }
 0x9ea   : > { %v1567_v62 = vmul.f32 %v1566_v61, %v1566_v61 }
 0x9ec   : > { %v1568_v63 = vsel %vm713_vm1, %v1567_v62, 0.0 }
 0x9ed   : > { %1569 = vadd.xlane.f32.xlu1 %v1568_v63 }
 0xa7a   : > { %v1570_v1 = vpop.xlane.xlu1 %1569 }
 0xa7b   : > { %v1571_v2 = vmul.f32 0.03125, %v1570_v1 }
 0xa7d   : > { %v1572_v3 = vadd.f32 1e-12, %v1571_v2 }
 0xa7f   : > { %2090 = vrsqrt.f32 %v1572_v3 }
 0xa89   : > { %v2091_v4 = vpop.eup %2090 }
 0xa8a   : > { %v1574_v6 = vmul.f32 %v2091_v4, %v1566_v61 }
 0xa8c   : > { %v1581_v9 = vmul.f32 %v1807_v5, %v1574_v6 }
 0xa8e   : > { %v1588_v10 = vadd.f32 %v1808_v8, %v1581_v9 }
 0xa90   : > { %1589 = vst.msk [vmem:[%s664_s17] sm:$0xff] %vm713_vm1, %v1588_v10 }
 0xa91   : > { %2245 = shalt.err (!%p2242_p6)
}
 0xa92   : > { %s2246_s19 = scalar_lea.hbm %s2788_s30, 128  ;;  %s2250_s21 = scalar_lea.hbm %s2905_s23, 256 }
 0xa93   : > { %p2247_p7 = scmp.ne.s32.totalorder %s2788_s30, %s2246_s19  ;;  %p2251_p4 = scmp.lt.u32.totalorder %s2788_s30, %s2905_s23 }
 0xa94   : > { %p2252_p8 = scmp.lt.u32.totalorder %s2250_s21, %s2246_s19  ;;  %p2254_p1 = scmp.lt.u32.totalorder %s2246_s19, %s2788_s30 }
 0xa95   : > { %p2248_p9 = pnand %p2247_p7, %p2906_p10 }
 0xa96   : > { %p2253_p13 = por %p2252_p8, %p2251_p4 }
 0xa97   : > { %p2249_p12 = pneg %p2248_p9 }
 0xa98   : > { %p2255_p11 = por %p2254_p1, %p2253_p13 }
 0xa9a   : > { %p2256_p0 = pnand %p2255_p11, %p2249_p12 }
 0xa9c   : > { %2259 = shalt.err (!%p2256_p0)
}
 0xa9d   : > { %1959 = dma.vmem_to_hbm [thread:$0]  (%p2906_p10), %s2790_s3, 128, %s2788_s30, %s1591_s1  }
 0xa9e PF: > { %s2907_s25 = sld [smem:[#allocation22_spill]]  ;;  %s2908_s17 = sld [smem:[#allocation18_spill]] }
 0xa9f   : > { %s2909_s24 = sld [smem:[#allocation25_spill]] }
 0xaa4   : > { %p1991_p2 = scmp.ge.s32.totalorder %s2907_s25, 2  ;;  %s1617_s18 = sand.u32 1, %s2908_s17  }
 0xaa5   : > { %p2910_p3 = scmp.ne.s32.totalorder %s2909_s24, 0  ;;  %s1618_s26 = scalar_lea.sflag [#allocation6], %s1617_s18 }
 0xaa7   : > { %p1978_p5 = pnand %p1991_p2, %p2910_p3 }
 0xaa9   : > { %2297 = dma.done.wait (!%p1978_p5), %s1618_s26, 128  }
 0xaaa   : > { %2299 = vsyncadd (!%p1978_p5), %s1618_s26, 4294967168  ;;  %s33_s29 = sadd.s32 1, %s2907_s25   ;;  %s2911_s24 = sld [smem:[#allocation19_spill]] }
 0xaab   : > { %p30_p6 = scmp.ge.s32.totalorder %s33_s29, 4   ;;  %s2912_s25 = sld [smem:[#allocation20_spill]] }
 0xaac   : > { %s2913_s26 = sld [smem:[#allocation26_spill]]  ;;  %s2914_s27 = sld [smem:[#allocation21_spill]] }
 0xaad   : > { %s2915_s28 = sld [smem:[#allocation23_spill]]  ;;  %32 = sbr.rel (!%p30_p6) target bundleno = 14 (0xe), region = 154 }
 0xab4   :  { %1623 = vsyncpa [#allocation5], 1 }
 0xab5   :  { %1625 = vsyncpa [#allocation5 + $0x1], 1 }
 0xab6   :  { %1626 = vsyncpa [#allocation8], 1 }
 0xab7   :  { %1627 = vsyncpa [#allocation11], 1 }
 0xab8   :  { %1628 = vsyncpa [#allocation6], 1 }
 0xab9   :  { %1630 = vsyncpa [#allocation6 + $0x1], 1 }

</bundles_post_ra>
